<compile_context>
chip_gen: v5e
topology: v5e:2x2
jax: 0.10.0
libtpu: 0.0.40
codegen_flags: <defaults>
</compile_context>

<pallas_src>
import functools

import jax
import jax.numpy as jnp
from jax.experimental import pallas as pl
from jax.experimental.pallas import tpu as pltpu

_BN_EPS = 1e-5
_LANE = 128       # feature-dim padding (lane width)
_NODE_PAD = 256   # node-dim padding (full MXU contraction on v6e/v7x, 2x128 on v5e)
_TM = 128         # adjacency row-block height per grid step


def _round_up(v, m):
    return ((v + m - 1) // m) * m


# ---------------------------------------------------------------------------
# Per-layer kernel: one [TM, Np] adjacency row block per grid step.
# ---------------------------------------------------------------------------
def _sage_layer_kernel(adj_ref, act_ref, self_ref, w_ref, b_ref, o_ref, *, relu):
    # adj_ref : [TM, Np]          bf16 row block of row-normalized adjacency
    # act_ref : [Np, Fin_p]       bf16 full previous-layer activations (resident)
    # self_ref: [TM, Fin_p]       bf16 row block of activations (root branch)
    # w_ref   : [2*Fin_p, Fout_p] bf16 stacked [W_l; W_r] (BN folded)
    # b_ref   : [1, Fout_p]       f32 bias (BN folded)
    agg = jnp.dot(adj_ref[...], act_ref[...],
                  preferred_element_type=jnp.float32)          # mean aggregation
    lhs = jnp.concatenate([agg.astype(jnp.bfloat16), self_ref[...]], axis=1)
    h = jnp.dot(lhs, w_ref[...],
                preferred_element_type=jnp.float32) + b_ref[...]
    if relu:
        h = jnp.maximum(h, 0.0)                                # ReLU (dropout = id, eval)
    o_ref[...] = h.astype(o_ref.dtype)


def _vmem_limit_bytes(tm, n_p, fin_p, fout_p, out_itemsize):
    bf = 2
    resident = (
        2 * tm * n_p * bf             # double-buffered adj row blocks
        + 2 * n_p * fin_p * bf        # resident activations (counted x2, safety)
        + 2 * tm * fin_p * bf         # self row blocks (double buffered)
        + 2 * 2 * fin_p * fout_p * bf # stacked weights
        + 2 * fout_p * 4              # bias
        + 2 * tm * fout_p * out_itemsize  # output blocks
        + tm * (n_p + 2 * fin_p + fout_p) * 4  # f32 intermediates headroom
    )
    return int(min(max(resident * 3 // 2, 16 << 20), 64 << 20))


def _sage_layer(adj_p, act_p, w_p, b_p, *, relu, out_dtype, tm):
    n_p, fin_p = act_p.shape
    fout_p = w_p.shape[1]
    grid = (n_p // tm,)
    vmem_limit = _vmem_limit_bytes(tm, n_p, fin_p, fout_p,
                                   jnp.dtype(out_dtype).itemsize)
    return pl.pallas_call(
        functools.partial(_sage_layer_kernel, relu=relu),
        out_shape=jax.ShapeDtypeStruct((n_p, fout_p), out_dtype),
        grid=grid,
        in_specs=[
            pl.BlockSpec((tm, n_p), lambda i: (i, 0)),           # streamed adj rows
            pl.BlockSpec((n_p, fin_p), lambda i: (0, 0)),        # resident activations
            pl.BlockSpec((tm, fin_p), lambda i: (i, 0)),         # self row block
            pl.BlockSpec((2 * fin_p, fout_p), lambda i: (0, 0)), # stacked weights
            pl.BlockSpec((1, fout_p), lambda i: (0, 0)),         # bias
        ],
        out_specs=pl.BlockSpec((tm, fout_p), lambda i: (i, 0)),
        compiler_params=pltpu.CompilerParams(
            dimension_semantics=("parallel",),
            vmem_limit_bytes=vmem_limit),
    )(adj_p, act_p, act_p, w_p, b_p)


# ---------------------------------------------------------------------------
# Jitted forward: pad x -> per-layer row-tiled pallas_calls -> slice.
# ---------------------------------------------------------------------------
@functools.partial(jax.jit, static_argnames=("out_channels",))
def sage_forward(prepared, x, adj_padded, *, out_channels):
    n, f_in = x.shape
    n_p = adj_padded.shape[0]
    fin_p = prepared[0][0].shape[0] // 2
    act = jnp.zeros((n_p, fin_p), jnp.bfloat16)
    act = act.at[:n, :f_in].set(x.astype(jnp.bfloat16))

    num_layers = len(prepared)
    tm = min(_TM, n_p)
    for i, (w_p, b_p) in enumerate(prepared):
        last = (i == num_layers - 1)
        act = _sage_layer(adj_padded, act, w_p, b_p,
                          relu=not last,
                          out_dtype=jnp.float32 if last else jnp.bfloat16,
                          tm=tm)
    return act[:n, :out_channels]


# ---------------------------------------------------------------------------
# Parameter construction (mirrors the torch module), BN folding, padding.
# ---------------------------------------------------------------------------
def init_sage_params(key, in_channels, hidden_channels, out_channels, num_layers):
    dims = [in_channels] + [hidden_channels] * (num_layers - 1) + [out_channels]
    params = []
    for i in range(num_layers):
        fan_in, fan_out = dims[i], dims[i + 1]
        key, kl, kr, kb = jax.random.split(key, 4)
        bound = 1.0 / jnp.sqrt(jnp.float32(fan_in))
        layer = {
            # stored pre-transposed: [fan_in, fan_out]
            "wl": jax.random.uniform(kl, (fan_in, fan_out), jnp.float32, -bound, bound),
            "wr": jax.random.uniform(kr, (fan_in, fan_out), jnp.float32, -bound, bound),
            "b": jax.random.uniform(kb, (fan_out,), jnp.float32, -bound, bound),
        }
        if i < num_layers - 1:  # hidden layer -> BatchNorm1d (running stats)
            layer["gamma"] = jnp.ones((fan_out,), jnp.float32)
            layer["beta"] = jnp.zeros((fan_out,), jnp.float32)
            layer["mean"] = jnp.zeros((fan_out,), jnp.float32)
            layer["var"] = jnp.ones((fan_out,), jnp.float32)
        params.append(layer)
    return params


def fold_and_pad_params(params):
    """Fold eval-mode BN into (wl, wr, b), stack [wl; wr], pad dims, cast bf16."""
    prepared = []
    num_layers = len(params)
    for i, layer in enumerate(params):
        wl, wr, b = layer["wl"], layer["wr"], layer["b"]
        if i < num_layers - 1:
            scale = layer["gamma"] * jax.lax.rsqrt(layer["var"] + _BN_EPS)
            shift = layer["beta"] - layer["mean"] * scale
            wl = wl * scale
            wr = wr * scale
            b = b * scale + shift
        fi, fo = wl.shape
        fi_p, fo_p = _round_up(fi, _LANE), _round_up(fo, _LANE)
        w_p = jnp.zeros((2 * fi_p, fo_p), jnp.bfloat16)
        w_p = w_p.at[:fi, :fo].set(wl.astype(jnp.bfloat16))               # agg branch
        w_p = w_p.at[fi_p:fi_p + fi, :fo].set(wr.astype(jnp.bfloat16))    # root branch
        b_p = jnp.zeros((1, fo_p), jnp.float32).at[0, :fo].set(b)
        prepared.append((w_p, b_p))
    return prepared


def prepare_adjacency(adj_norm):
    """Pad the dense row-normalized adjacency once (static across forwards)."""
    n = adj_norm.shape[0]
    n_p = _round_up(max(n, _NODE_PAD), _NODE_PAD)
    adj_p = jnp.zeros((n_p, n_p), jnp.bfloat16)
    return adj_p.at[:n, :n].set(adj_norm.astype(jnp.bfloat16))


# ---------------------------------------------------------------------------
# Pure-JAX f32 reference (unfolded BN) for correctness checking.
# ---------------------------------------------------------------------------
def sage_reference(params, x, adj_norm):
    num_layers = len(params)
    for i, layer in enumerate(params):
        agg = adj_norm @ x
        h = agg @ layer["wl"] + x @ layer["wr"] + layer["b"]
        if i < num_layers - 1:
            h = (h - layer["mean"]) * jax.lax.rsqrt(layer["var"] + _BN_EPS)
            h = h * layer["gamma"] + layer["beta"]
            x = jnp.maximum(h, 0.0)
        else:
            x = h
    return x


if __name__ == "__main__":
    in_channels, hidden_channels, out_channels = 16, 32, 8
    num_layers = 3
    dropout = 0.5          # inactive in eval mode
    num_nodes = 8

    key = jax.random.PRNGKey(0)
    key_p, key_x, key_a = jax.random.split(key, 3)

    params = init_sage_params(key_p, in_channels, hidden_channels,
                              out_channels, num_layers)
    prepared = fold_and_pad_params(params)

    x = jax.random.normal(key_x, (num_nodes, in_channels), jnp.float32)

    # dense row-normalized adjacency (mean aggregation over neighbors)
    a = (jax.random.uniform(key_a, (num_nodes, num_nodes)) < 0.4).astype(jnp.float32)
    a = a * (1.0 - jnp.eye(num_nodes, dtype=jnp.float32))
    deg = jnp.maximum(a.sum(axis=1, keepdims=True), 1.0)
    adj_norm = a / deg

    adj_padded = prepare_adjacency(adj_norm)   # hoisted out of the forward path

    out = sage_forward(prepared, x, adj_padded, out_channels=out_channels)
    out = jax.block_until_ready(out)

    ref = sage_reference(params, x, adj_norm)
    assert out.shape == (num_nodes, out_channels)
    # bf16 matmul inputs (f32 accumulation) -> loosened tolerance vs f32 reference.
    max_err = float(jnp.max(jnp.abs(out - ref)))
    assert jnp.allclose(out, ref, atol=1e-1, rtol=1e-1), (
        f"mismatch vs reference: max abs err = {max_err}")

    print("KERNEL_OK")
</pallas_src>

<mosaic_0001>
module attributes {stable_mosaic.version = 11 : i64} {
  func.func @_sage_layer_kernel(%arg0: i32, %arg1: memref<128x256xbf16, #tpu.memory_space<vmem>>, %arg2: memref<256x128xbf16, #tpu.memory_space<vmem>>, %arg3: memref<128x128xbf16, #tpu.memory_space<vmem>>, %arg4: memref<256x128xbf16, #tpu.memory_space<vmem>>, %arg5: memref<1x128xf32, #tpu.memory_space<vmem>>, %arg6: memref<128x128xbf16, #tpu.memory_space<vmem>>) attributes {dimension_semantics = [#tpu.dimension_semantics<parallel>], iteration_bounds = array<i64: 2>, scalar_prefetch = 0 : i64, scratch_operands = 0 : i64, tpu.core_type = #tpu.core_type<tc>, window_params = [{transform_indices = @transform_0, window_bounds = array<i64: 128, 256>}, {pipeline_mode = #tpu.pipeline_mode<synchronous>, transform_indices = @transform_1, window_bounds = array<i64: 256, 128>}, {transform_indices = @transform_2, window_bounds = array<i64: 128, 128>}, {pipeline_mode = #tpu.pipeline_mode<synchronous>, transform_indices = @transform_3, window_bounds = array<i64: 256, 128>}, {pipeline_mode = #tpu.pipeline_mode<synchronous>, transform_indices = @transform_4, window_bounds = array<i64: 1, 128>}, {transform_indices = @transform_5, window_bounds = array<i64: 128, 128>}]} {
    %c0 = arith.constant 0 : index
    %c0_0 = arith.constant 0 : index
    %0 = vector.load %arg1[%c0, %c0_0] : memref<128x256xbf16, #tpu.memory_space<vmem>>, vector<128x256xbf16>
    %c0_1 = arith.constant 0 : index
    %c0_2 = arith.constant 0 : index
    %1 = vector.load %arg2[%c0_1, %c0_2] : memref<256x128xbf16, #tpu.memory_space<vmem>>, vector<256x128xbf16>
    %cst = arith.constant dense<0.000000e+00> : vector<128x128xf32>
    %2 = tpu.matmul %0, %1, %cst {dimension_numbers = #tpu.dot_dimension_numbers<[1], [0], [0], [1], [0, 0, 1, 1], [], []>} : vector<128x256xbf16>, vector<256x128xbf16>, vector<128x128xf32> -> vector<128x128xf32>
    %3 = arith.truncf %2 : vector<128x128xf32> to vector<128x128xbf16>
    %c0_3 = arith.constant 0 : index
    %c0_4 = arith.constant 0 : index
    %4 = vector.load %arg3[%c0_3, %c0_4] : memref<128x128xbf16, #tpu.memory_space<vmem>>, vector<128x128xbf16>
    %5 = tpu.concatenate %3, %4 in 1 : vector<128x128xbf16>, vector<128x128xbf16> -> vector<128x256xbf16>
    %c0_5 = arith.constant 0 : index
    %c0_6 = arith.constant 0 : index
    %6 = vector.load %arg4[%c0_5, %c0_6] : memref<256x128xbf16, #tpu.memory_space<vmem>>, vector<256x128xbf16>
    %cst_7 = arith.constant dense<0.000000e+00> : vector<128x128xf32>
    %7 = tpu.matmul %5, %6, %cst_7 {dimension_numbers = #tpu.dot_dimension_numbers<[1], [0], [0], [1], [0, 0, 1, 1], [], []>} : vector<128x256xbf16>, vector<256x128xbf16>, vector<128x128xf32> -> vector<128x128xf32>
    %c0_8 = arith.constant 0 : index
    %c0_9 = arith.constant 0 : index
    %8 = vector.load %arg5[%c0_8, %c0_9] : memref<1x128xf32, #tpu.memory_space<vmem>>, vector<1x128xf32>
    %9 = vector.broadcast %8 : vector<1x128xf32> to vector<128x128xf32>
    %10 = arith.addf %7, %9 : vector<128x128xf32>
    %cst_10 = arith.constant 0.000000e+00 : f32
    %11 = vector.broadcast %cst_10 : f32 to vector<128x128xf32>
    %12 = arith.maximumf %10, %11 : vector<128x128xf32>
    %13 = arith.truncf %12 : vector<128x128xf32> to vector<128x128xbf16>
    %c0_11 = arith.constant 0 : index
    %c0_12 = arith.constant 0 : index
    %14 = vector.load %arg6[%c0_11, %c0_12] : memref<128x128xbf16, #tpu.memory_space<vmem>>, vector<128x128xbf16>
    tpu.vector_store %arg6[%c0_11, %c0_12], %13 {strides = array<i32>} : memref<128x128xbf16, #tpu.memory_space<vmem>>, vector<128x128xbf16>,
    return
  }
  func.func @transform_0(%arg0: i32) -> (i32, i32) {
    %c0_i32 = arith.constant 0 : i32
    %c0_i32_0 = arith.constant 0 : i32
    return %arg0, %c0_i32 : i32, i32
  }
  func.func @transform_1(%arg0: i32) -> (i32, i32) {
    %c0_i32 = arith.constant 0 : i32
    %c0_i32_0 = arith.constant 0 : i32
    %c0_i32_1 = arith.constant 0 : i32
    return %c0_i32, %c0_i32_0 : i32, i32
  }
  func.func @transform_2(%arg0: i32) -> (i32, i32) {
    %c0_i32 = arith.constant 0 : i32
    %c0_i32_0 = arith.constant 0 : i32
    return %arg0, %c0_i32 : i32, i32
  }
  func.func @transform_3(%arg0: i32) -> (i32, i32) {
    %c0_i32 = arith.constant 0 : i32
    %c0_i32_0 = arith.constant 0 : i32
    %c0_i32_1 = arith.constant 0 : i32
    return %c0_i32, %c0_i32_0 : i32, i32
  }
  func.func @transform_4(%arg0: i32) -> (i32, i32) {
    %c0_i32 = arith.constant 0 : i32
    %c0_i32_0 = arith.constant 0 : i32
    %c0_i32_1 = arith.constant 0 : i32
    return %c0_i32, %c0_i32_0 : i32, i32
  }
  func.func @transform_5(%arg0: i32) -> (i32, i32) {
    %c0_i32 = arith.constant 0 : i32
    %c0_i32_0 = arith.constant 0 : i32
    return %arg0, %c0_i32 : i32, i32
  }
}

module attributes {stable_mosaic.version = 11 : i64} {
  func.func @_sage_layer_kernel(%arg0: i32, %arg1: memref<128x256xbf16, #tpu.memory_space<vmem>>, %arg2: memref<256x128xbf16, #tpu.memory_space<vmem>>, %arg3: memref<128x128xbf16, #tpu.memory_space<vmem>>, %arg4: memref<256x128xbf16, #tpu.memory_space<vmem>>, %arg5: memref<1x128xf32, #tpu.memory_space<vmem>>, %arg6: memref<128x128xbf16, #tpu.memory_space<vmem>>) attributes {dimension_semantics = [#tpu.dimension_semantics<parallel>], iteration_bounds = array<i64: 2>, scalar_prefetch = 0 : i64, scratch_operands = 0 : i64, tpu.core_type = #tpu.core_type<tc>, window_params = [{transform_indices = @transform_0, window_bounds = array<i64: 128, 256>}, {pipeline_mode = #tpu.pipeline_mode<synchronous>, transform_indices = @transform_1, window_bounds = array<i64: 256, 128>}, {transform_indices = @transform_2, window_bounds = array<i64: 128, 128>}, {pipeline_mode = #tpu.pipeline_mode<synchronous>, transform_indices = @transform_3, window_bounds = array<i64: 256, 128>}, {pipeline_mode = #tpu.pipeline_mode<synchronous>, transform_indices = @transform_4, window_bounds = array<i64: 1, 128>}, {transform_indices = @transform_5, window_bounds = array<i64: 128, 128>}]} {
    %c0 = arith.constant 0 : index
    %c0_0 = arith.constant 0 : index
    %0 = vector.load %arg1[%c0, %c0_0] : memref<128x256xbf16, #tpu.memory_space<vmem>>, vector<128x256xbf16>
    %c0_1 = arith.constant 0 : index
    %c0_2 = arith.constant 0 : index
    %1 = vector.load %arg2[%c0_1, %c0_2] : memref<256x128xbf16, #tpu.memory_space<vmem>>, vector<256x128xbf16>
    %cst = arith.constant dense<0.000000e+00> : vector<128x128xf32>
    %2 = tpu.matmul %0, %1, %cst {dimension_numbers = #tpu.dot_dimension_numbers<[1], [0], [0], [1], [0, 0, 1, 1], [], []>} : vector<128x256xbf16>, vector<256x128xbf16>, vector<128x128xf32> -> vector<128x128xf32>
    %3 = arith.truncf %2 : vector<128x128xf32> to vector<128x128xbf16>
    %c0_3 = arith.constant 0 : index
    %c0_4 = arith.constant 0 : index
    %4 = vector.load %arg3[%c0_3, %c0_4] : memref<128x128xbf16, #tpu.memory_space<vmem>>, vector<128x128xbf16>
    %5 = tpu.concatenate %3, %4 in 1 : vector<128x128xbf16>, vector<128x128xbf16> -> vector<128x256xbf16>
    %c0_5 = arith.constant 0 : index
    %c0_6 = arith.constant 0 : index
    %6 = vector.load %arg4[%c0_5, %c0_6] : memref<256x128xbf16, #tpu.memory_space<vmem>>, vector<256x128xbf16>
    %cst_7 = arith.constant dense<0.000000e+00> : vector<128x128xf32>
    %7 = tpu.matmul %5, %6, %cst_7 {dimension_numbers = #tpu.dot_dimension_numbers<[1], [0], [0], [1], [0, 0, 1, 1], [], []>} : vector<128x256xbf16>, vector<256x128xbf16>, vector<128x128xf32> -> vector<128x128xf32>
    %c0_8 = arith.constant 0 : index
    %c0_9 = arith.constant 0 : index
    %8 = vector.load %arg5[%c0_8, %c0_9] : memref<1x128xf32, #tpu.memory_space<vmem>>, vector<1x128xf32>
    %9 = vector.broadcast %8 : vector<1x128xf32> to vector<128x128xf32>
    %10 = arith.addf %7, %9 : vector<128x128xf32>
    %cst_10 = arith.constant 0.000000e+00 : f32
    %11 = vector.broadcast %cst_10 : f32 to vector<128x128xf32>
    %12 = arith.maximumf %10, %11 : vector<128x128xf32>
    %13 = arith.truncf %12 : vector<128x128xf32> to vector<128x128xbf16>
    %c0_11 = arith.constant 0 : index
    %c0_12 = arith.constant 0 : index
    %14 = vector.load %arg6[%c0_11, %c0_12] : memref<128x128xbf16, #tpu.memory_space<vmem>>, vector<128x128xbf16>
    tpu.vector_store %arg6[%c0_11, %c0_12], %13 {strides = array<i32>} : memref<128x128xbf16, #tpu.memory_space<vmem>>, vector<128x128xbf16>,
    return
  }
  func.func @transform_0(%arg0: i32) -> (i32, i32) {
    %c0_i32 = arith.constant 0 : i32
    %c0_i32_0 = arith.constant 0 : i32
    return %arg0, %c0_i32 : i32, i32
  }
  func.func @transform_1(%arg0: i32) -> (i32, i32) {
    %c0_i32 = arith.constant 0 : i32
    %c0_i32_0 = arith.constant 0 : i32
    %c0_i32_1 = arith.constant 0 : i32
    return %c0_i32, %c0_i32_0 : i32, i32
  }
  func.func @transform_2(%arg0: i32) -> (i32, i32) {
    %c0_i32 = arith.constant 0 : i32
    %c0_i32_0 = arith.constant 0 : i32
    return %arg0, %c0_i32 : i32, i32
  }
  func.func @transform_3(%arg0: i32) -> (i32, i32) {
    %c0_i32 = arith.constant 0 : i32
    %c0_i32_0 = arith.constant 0 : i32
    %c0_i32_1 = arith.constant 0 : i32
    return %c0_i32, %c0_i32_0 : i32, i32
  }
  func.func @transform_4(%arg0: i32) -> (i32, i32) {
    %c0_i32 = arith.constant 0 : i32
    %c0_i32_0 = arith.constant 0 : i32
    %c0_i32_1 = arith.constant 0 : i32
    return %c0_i32, %c0_i32_0 : i32, i32
  }
  func.func @transform_5(%arg0: i32) -> (i32, i32) {
    %c0_i32 = arith.constant 0 : i32
    %c0_i32_0 = arith.constant 0 : i32
    return %arg0, %c0_i32 : i32, i32
  }
}

module attributes {stable_mosaic.version = 11 : i64} {
  func.func @_sage_layer_kernel(%arg0: i32, %arg1: memref<128x256xbf16, #tpu.memory_space<vmem>>, %arg2: memref<256x128xbf16, #tpu.memory_space<vmem>>, %arg3: memref<128x128xbf16, #tpu.memory_space<vmem>>, %arg4: memref<256x128xbf16, #tpu.memory_space<vmem>>, %arg5: memref<1x128xf32, #tpu.memory_space<vmem>>, %arg6: memref<128x128xf32, #tpu.memory_space<vmem>>) attributes {dimension_semantics = [#tpu.dimension_semantics<parallel>], iteration_bounds = array<i64: 2>, scalar_prefetch = 0 : i64, scratch_operands = 0 : i64, tpu.core_type = #tpu.core_type<tc>, window_params = [{transform_indices = @transform_0, window_bounds = array<i64: 128, 256>}, {pipeline_mode = #tpu.pipeline_mode<synchronous>, transform_indices = @transform_1, window_bounds = array<i64: 256, 128>}, {transform_indices = @transform_2, window_bounds = array<i64: 128, 128>}, {pipeline_mode = #tpu.pipeline_mode<synchronous>, transform_indices = @transform_3, window_bounds = array<i64: 256, 128>}, {pipeline_mode = #tpu.pipeline_mode<synchronous>, transform_indices = @transform_4, window_bounds = array<i64: 1, 128>}, {transform_indices = @transform_5, window_bounds = array<i64: 128, 128>}]} {
    %c0 = arith.constant 0 : index
    %c0_0 = arith.constant 0 : index
    %0 = vector.load %arg1[%c0, %c0_0] : memref<128x256xbf16, #tpu.memory_space<vmem>>, vector<128x256xbf16>
    %c0_1 = arith.constant 0 : index
    %c0_2 = arith.constant 0 : index
    %1 = vector.load %arg2[%c0_1, %c0_2] : memref<256x128xbf16, #tpu.memory_space<vmem>>, vector<256x128xbf16>
    %cst = arith.constant dense<0.000000e+00> : vector<128x128xf32>
    %2 = tpu.matmul %0, %1, %cst {dimension_numbers = #tpu.dot_dimension_numbers<[1], [0], [0], [1], [0, 0, 1, 1], [], []>} : vector<128x256xbf16>, vector<256x128xbf16>, vector<128x128xf32> -> vector<128x128xf32>
    %3 = arith.truncf %2 : vector<128x128xf32> to vector<128x128xbf16>
    %c0_3 = arith.constant 0 : index
    %c0_4 = arith.constant 0 : index
    %4 = vector.load %arg3[%c0_3, %c0_4] : memref<128x128xbf16, #tpu.memory_space<vmem>>, vector<128x128xbf16>
    %5 = tpu.concatenate %3, %4 in 1 : vector<128x128xbf16>, vector<128x128xbf16> -> vector<128x256xbf16>
    %c0_5 = arith.constant 0 : index
    %c0_6 = arith.constant 0 : index
    %6 = vector.load %arg4[%c0_5, %c0_6] : memref<256x128xbf16, #tpu.memory_space<vmem>>, vector<256x128xbf16>
    %cst_7 = arith.constant dense<0.000000e+00> : vector<128x128xf32>
    %7 = tpu.matmul %5, %6, %cst_7 {dimension_numbers = #tpu.dot_dimension_numbers<[1], [0], [0], [1], [0, 0, 1, 1], [], []>} : vector<128x256xbf16>, vector<256x128xbf16>, vector<128x128xf32> -> vector<128x128xf32>
    %c0_8 = arith.constant 0 : index
    %c0_9 = arith.constant 0 : index
    %8 = vector.load %arg5[%c0_8, %c0_9] : memref<1x128xf32, #tpu.memory_space<vmem>>, vector<1x128xf32>
    %9 = vector.broadcast %8 : vector<1x128xf32> to vector<128x128xf32>
    %10 = arith.addf %7, %9 : vector<128x128xf32>
    %c0_10 = arith.constant 0 : index
    %c0_11 = arith.constant 0 : index
    %11 = vector.load %arg6[%c0_10, %c0_11] : memref<128x128xf32, #tpu.memory_space<vmem>>, vector<128x128xf32>
    tpu.vector_store %arg6[%c0_10, %c0_11], %10 {strides = array<i32>} : memref<128x128xf32, #tpu.memory_space<vmem>>, vector<128x128xf32>,
    return
  }
  func.func @transform_0(%arg0: i32) -> (i32, i32) {
    %c0_i32 = arith.constant 0 : i32
    %c0_i32_0 = arith.constant 0 : i32
    return %arg0, %c0_i32 : i32, i32
  }
  func.func @transform_1(%arg0: i32) -> (i32, i32) {
    %c0_i32 = arith.constant 0 : i32
    %c0_i32_0 = arith.constant 0 : i32
    %c0_i32_1 = arith.constant 0 : i32
    return %c0_i32, %c0_i32_0 : i32, i32
  }
  func.func @transform_2(%arg0: i32) -> (i32, i32) {
    %c0_i32 = arith.constant 0 : i32
    %c0_i32_0 = arith.constant 0 : i32
    return %arg0, %c0_i32 : i32, i32
  }
  func.func @transform_3(%arg0: i32) -> (i32, i32) {
    %c0_i32 = arith.constant 0 : i32
    %c0_i32_0 = arith.constant 0 : i32
    %c0_i32_1 = arith.constant 0 : i32
    return %c0_i32, %c0_i32_0 : i32, i32
  }
  func.func @transform_4(%arg0: i32) -> (i32, i32) {
    %c0_i32 = arith.constant 0 : i32
    %c0_i32_0 = arith.constant 0 : i32
    %c0_i32_1 = arith.constant 0 : i32
    return %c0_i32, %c0_i32_0 : i32, i32
  }
  func.func @transform_5(%arg0: i32) -> (i32, i32) {
    %c0_i32 = arith.constant 0 : i32
    %c0_i32_0 = arith.constant 0 : i32
    return %arg0, %c0_i32 : i32, i32
  }
}

</mosaic_0001>

<bundles_post_ra>
// kernel: sage_forward.3
= control target key start
LH: loop header
LB: loop body
LE: loop exit
PB: predicated region body
PF: predicated region fallthrough
CT: control target
= control target key end

     0   :  { %10 = vsyncpa [#allocation3], 0  ;;  %s1836_s0 = inlined_call_operand.hbm [shape: bf16[256,256], index: 0, kind: input, shape index: {}]   ;;  %s1837_s1 = inlined_call_operand.vmem [shape: bf16[256,128], index: 1, kind: input, shape index: {}, may-alias: {1,2}]   ;;  %s1838_s2 = inlined_call_operand.vmem [shape: bf16[256,128], index: 2, kind: input, shape index: {}, may-alias: {1,2}]   ;;  %s1839_s3 = inlined_call_operand.vmem [shape: bf16[256,128], index: 3, kind: input, shape index: {}]   ;;  %s1840_s4 = inlined_call_operand.vmem [shape: f32[1,128], index: 4, kind: input, shape index: {}]   ;;  %s1841_s5 = inlined_call_operand.vmem [shape: bf16[256,128], index: 5, kind: output, shape index: {}]  }
   0x1   :  { %12 = vsyncpa [#allocation3 + $0x1], 0  ;;  %s1564_s18 = smov 0   ;;  %s1566_s19 = smov 0  }
   0x2   :  { %s1568_s20 = smov 0   ;;  %s1570_s21 = smov 0  }
   0x3 LB: > { %s1079_s22 = sadd.s32 4294967295, %s1530_s21   ;;  %s1584_s23 = sadd.s32 1, %s1530_s21   ;;  %s1530_s21 = sphi %s1570_s21, %s1848_s21   ;;  %s1526_s20 = sphi %s1568_s20, %s1847_s20   ;;  %s1522_s19 = sphi %s1566_s19, %s1846_s19   ;;  %s1518_s18 = sphi %s1564_s18, %s1845_s18  }
   0x4   : > { %s22_s24 = ssub.s32 %s1530_s21, %s1584_s23  ;;  %s25_s25 = sadd.s32 1, %s1526_s20 }
   0x5   : > { %p23_p0 = scmp.eq.s32.totalorder %s22_s24, 0  ;;  %p32_p1 = scmp.ne.s32.totalorder %s1526_s20, %s1522_s19 }
   0x6   : > { %p33_p2 = scmp.eq.s32.totalorder %s1530_s21, 0  ;;  %p38_p3 = scmp.ne.s32.totalorder %s1522_s19, %s1518_s18 }
   0x7   : > { %s1594_s26 = scalar_select %p23_p0, %s1526_s20, %s25_s25  }
   0x8   : > { %p1596_p4 = por %p33_p2, %p32_p1  ;;  %p39_p5 = scmp.eq.s32.totalorder %s1079_s22, 0 }
   0x9   : > { %p1430_p6 = scmp.lt.s32.totalorder %s1530_s21, 2  ;;  %s186_s29 = sand.u32 1, %s1526_s20  }
   0xa   : > { %p1603_p7 = por %p39_p5, %p38_p3  ;;  %s1083_s30 = sshll.u32 %s186_s29, 7 }
   0xb   : > { %s1320_s6 = sshll.u32 %s1530_s21, 7  ;;  %s190_s10 = scalar_lea.vmem [#allocation2], %s1083_s30 }
   0xc   : > { %s196_s9 = scalar_lea.hbm %s1836_s0, %s1320_s6  ;;  %s199_s11 = sshll.u32 %s190_s10, 4  ;;  %s200_s11 = int_to_ptr.vmem [resolvable:$true] %s199_s11 }
   0xd   : > { %s197_s12 = sshll.u32 %s196_s9, 4  ;;  %p1614_p8 = pnand %p1430_p6, %p1596_p4  ;;  %s198_s12 = int_to_ptr.hbm [resolvable:$true] %s197_s12 }
   0xe   : > { %p1087_p9 = scmp.ge.s32.totalorder %s1530_s21, 1  ;;  %s187_s14 = scalar_lea.sflag [#allocation3], %s186_s29 }
   0xf   : > { %s1466_s15 = sshra.s32 %s198_s12, 4  ;;  %p1470_p11 = pneg %p1614_p8  ;;  %s1467_s15 = int_to_ptr.hbm [resolvable:$true] %s1466_s15 }
  0x10   : > { %s1468_s16 = scalar_lea.hbm %s1467_s15, 128  ;;  %s1473_s24 = scalar_lea.hbm %s1836_s0, 256 }
  0x11   : > { %p1469_p10 = scmp.ne.s32.totalorder %s1467_s15, %s1468_s16  ;;  %p1474_p0 = scmp.lt.s32.totalorder %s1467_s15, %s1836_s0 }
  0x12   : > { %p1475_p1 = scmp.lt.s32.totalorder %s1473_s24, %s1468_s16 }
  0x13   : > { %p1471_p12 = pnand %p1470_p11, %p1469_p10 }
  0x14   : > { %p1476_p2 = por %p1475_p1, %p1474_p0 }
  0x15   : > { %p1472_p13 = pneg %p1471_p12 }
  0x17   : > { %p1477_p3 = pnand %p1476_p2, %p1472_p13 }
  0x19   : > { %1480 = shalt.err (!%p1477_p3)
}
  0x1a   : > { %s1532_s29 = smov 128   ;;  %s1533_s30 = smov 8  }
  0x1b   : > { %1429 = dma.hbm_to_vmem [thread:$0]  (!%p1614_p8), %s198_s12, 2048, %s200_s11, %s187_s14, %s1532_s29, %s1532_s29, %s1533_s30  }
  0x1c   : > { %p216_p4 = scmp.lt.s32.totalorder %s1530_s21, 3 }
  0x1e   : > { %p217_p5 = pnand %p1087_p9, %p216_p4 }
  0x1f   : > { %s222_s6 = sand.u32 (!%p217_p5), 1, %s1522_s19  }
  0x20   : > { %220 = sbr.rel (%p217_p5) target bundleno = 474 (0x1da), region = 40  ;;  %s1088_s7 = sshll.u32 (!%p217_p5), %s222_s6, 7 }
  0x21   : > { %s223_s8 = scalar_lea.sflag (!%p217_p5), [#allocation3], %s222_s6  ;;  %s1633_s9 = scalar_lea.vmem (!%p217_p5), [#allocation2], %s1088_s7 }
  0x25   : > { %1513 = dma.done.wait (%p1603_p7), %s223_s8, 2048  }
  0x26   : > { %1515 = vsyncadd (%p1603_p7), %s223_s8, 4294965248  ;;  %v1344_v0 = vld [vmem:[%s1837_s1 + $0x38] sm:$0xff]  ;;  %v1343_v2 = vld [vmem:[%s1837_s1 + $0x30] sm:$0xff]  ;;  %s1089_s27 = sshll.u32 %s1079_s22, 4 }
  0x27   : > { %v1352_v1 = vld [vmem:[%s1837_s1 + $0x78] sm:$0xff]  ;;  %496 = vmatpush.bf16.msra.mxu0 %v1344_v0  ;;  %v1351_v3 = vld [vmem:[%s1837_s1 + $0x70] sm:$0xff]  ;;  %v1342_v4 = vld [vmem:[%s1837_s1 + $0x28] sm:$0xff]  ;;  %p261_p6 = scmp.lt.s32.totalorder %s1089_s27, 31 }
  0x28   : > { %545 = vmatpush.bf16.msra.mxu1 %v1352_v1  ;;  %v1350_v5 = vld [vmem:[%s1837_s1 + $0x68] sm:$0xff]  ;;  %v1341_v6 = vld [vmem:[%s1837_s1 + $0x20] sm:$0xff]  ;;  %v1340_v8 = vld [vmem:[%s1837_s1 + $0x18] sm:$0xff] }
  0x29   : > { %v1349_v7 = vld [vmem:[%s1837_s1 + $0x60] sm:$0xff]  ;;  %v1348_v9 = vld [vmem:[%s1837_s1 + $0x58] sm:$0xff]  ;;  %v1339_v10 = vld [vmem:[%s1837_s1 + $0x10] sm:$0xff]  ;;  %s1850_s27 = smov (!%p261_p6, %s1089_s27), 31 }
  0x2a   : > { %v1347_v11 = vld [vmem:[%s1837_s1 + $0x50] sm:$0xff]  ;;  %v1338_v12 = vld [vmem:[%s1837_s1 + $0x8] sm:$0xff]  ;;  %v1337_v14 = vld [vmem:[%s1837_s1] sm:$0xff]  ;;  %s1090_s15 = sshll.u32 %s1850_s27, 2 }
  0x2b   : > { %497 = vmatpush.bf16.msra.mxu0 %v1343_v2  ;;  %v1346_v13 = vld [vmem:[%s1837_s1 + $0x48] sm:$0xff]  ;;  %v1345_v15 = vld [vmem:[%s1837_s1 + $0x40] sm:$0xff]  ;;  %v1103_v22 = vld [vmem:[%s1633_s9 + $0x10] sm:$0xf]  ;;  %s1767_s28 = scalar_lea.vmem %s1838_s2, %s1090_s15  ;;  %s1799_s21 = scalar_lea.vmem %s1841_s5, %s1090_s15 }
  0x2c   : > { %546 = vmatpush.bf16.msra.mxu1 %v1351_v3  ;;  %v1095_v16 = vld [vmem:[%s1633_s9] sm:$0xf]  ;;  %v1322_v17 = vld [vmem:[%s1633_s9 + $0x4] sm:$0xf0]  ;;  %v1321_v18 = vld [vmem:[%s1633_s9 + $0x4] sm:$0xf] }
  0x2d   : > { %v1097_v19 = vld [vmem:[%s1633_s9 + $0x8] sm:$0xf0]  ;;  %v1096_v20 = vor.u32 %v1322_v17, %v1095_v16  ;;  %v1324_v23 = vld [vmem:[%s1633_s9 + $0x14] sm:$0xf0]  ;;  %v1323_v24 = vld [vmem:[%s1633_s9 + $0x14] sm:$0xf] }
  0x2e   : > { %v1100_v21 = vor.u32 %v1321_v18, %v1097_v19  ;;  %v1105_v25 = vld [vmem:[%s1633_s9 + $0x18] sm:$0xf0]  ;;  %v1104_v26 = vor.u32 %v1324_v23, %v1103_v22  ;;  %v1111_v28 = vld [vmem:[%s1633_s9 + $0x20] sm:$0xf]  ;;  %v1326_v29 = vld [vmem:[%s1633_s9 + $0x24] sm:$0xf0] }
  0x2f   : > { %498 = vmatpush.bf16.msra.mxu0 %v1342_v4  ;;  %v1108_v27 = vor.u32 %v1323_v24, %v1105_v25  ;;  %v1325_v30 = vld [vmem:[%s1633_s9 + $0x24] sm:$0xf]  ;;  %v1113_v31 = vld [vmem:[%s1633_s9 + $0x28] sm:$0xf0]  ;;  %v1112_v32 = vor.u32 %v1326_v29, %v1111_v28  ;;  %v1119_v34 = vld [vmem:[%s1633_s9 + $0x30] sm:$0xf] }
  0x30   : > { %547 = vmatpush.bf16.msra.mxu1 %v1350_v5  ;;  %v1116_v33 = vor.u32 %v1325_v30, %v1113_v31  ;;  %v1328_v35 = vld [vmem:[%s1633_s9 + $0x34] sm:$0xf0]  ;;  %v1327_v36 = vld [vmem:[%s1633_s9 + $0x34] sm:$0xf]  ;;  %v1121_v37 = vld [vmem:[%s1633_s9 + $0x38] sm:$0xf0] }
  0x31   : > { %v1120_v38 = vor.u32 %v1328_v35, %v1119_v34  ;;  %v1124_v39 = vor.u32 %v1327_v36, %v1121_v37  ;;  %v1127_v40 = vld [vmem:[%s1633_s9 + $0x40] sm:$0xf]  ;;  %v1330_v41 = vld [vmem:[%s1633_s9 + $0x44] sm:$0xf0]  ;;  %v1329_v42 = vld [vmem:[%s1633_s9 + $0x44] sm:$0xf] }
  0x32   : > { %v1129_v43 = vld [vmem:[%s1633_s9 + $0x48] sm:$0xf0]  ;;  %v1128_v44 = vor.u32 %v1330_v41, %v1127_v40  ;;  %v1376_v46 = vld [vmem:[%s1839_s3 + $0x78] sm:$0xff]  ;;  %v1375_v48 = vld [vmem:[%s1839_s3 + $0x70] sm:$0xff] }
  0x33   : > { %499 = vmatpush.bf16.msra.mxu0 %v1341_v6  ;;  %v1132_v45 = vor.u32 %v1329_v42, %v1129_v43  ;;  %v1368_v47 = vld [vmem:[%s1839_s3 + $0x38] sm:$0xff]  ;;  %903 = vmatpush.bf16.msra.mxu3 %v1376_v46  ;;  %v1135_v49 = vld [vmem:[%s1633_s9 + $0x50] sm:$0xf]  ;;  %v1331_v51 = vld [vmem:[%s1633_s9 + $0x54] sm:$0xf] }
  0x34   : > { %548 = vmatpush.bf16.msra.mxu1 %v1349_v7  ;;  %854 = vmatpush.bf16.msra.mxu2 %v1368_v47  ;;  %v1332_v50 = vld [vmem:[%s1633_s9 + $0x54] sm:$0xf0]  ;;  %v1137_v52 = vld [vmem:[%s1633_s9 + $0x58] sm:$0xf0]  ;;  %v1374_v55 = vld [vmem:[%s1839_s3 + $0x68] sm:$0xff] }
  0x35   : > { %v1136_v53 = vor.u32 %v1332_v50, %v1135_v49  ;;  %v1140_v54 = vor.u32 %v1331_v51, %v1137_v52  ;;  %v1367_v56 = vld [vmem:[%s1839_s3 + $0x30] sm:$0xff]  ;;  %v1373_v57 = vld [vmem:[%s1839_s3 + $0x60] sm:$0xff]  ;;  %v1366_v58 = vld [vmem:[%s1839_s3 + $0x28] sm:$0xff] }
  0x36   : > { %v1372_v59 = vld [vmem:[%s1839_s3 + $0x58] sm:$0xff]  ;;  %v1365_v60 = vld [vmem:[%s1839_s3 + $0x20] sm:$0xff]  ;;  %v1334_v62 = vld [vmem:[%s1633_s9 + $0x64] sm:$0xf0] }
  0x37   : > { %500 = vmatpush.bf16.msra.mxu0 %v1340_v8  ;;  %904 = vmatpush.bf16.msra.mxu3 %v1375_v48  ;;  %v1143_v61 = vld [vmem:[%s1633_s9 + $0x60] sm:$0xf]  ;;  %v1333_v63 = vld [vmem:[%s1633_s9 + $0x64] sm:$0xf]  ;;  %v1145_v0 = vld [vmem:[%s1633_s9 + $0x68] sm:$0xf0] }
  0x38   : > { %549 = vmatpush.bf16.msra.mxu1 %v1348_v9  ;;  %855 = vmatpush.bf16.msra.mxu2 %v1367_v56  ;;  %v1371_v1 = vld [vmem:[%s1839_s3 + $0x50] sm:$0xff]  ;;  %v1144_v2 = vor.u32 %v1334_v62, %v1143_v61  ;;  %v1148_v3 = vor.u32 %v1333_v63, %v1145_v0  ;;  %v1364_v4 = vld [vmem:[%s1839_s3 + $0x18] sm:$0xff]  ;;  %v1370_v5 = vld [vmem:[%s1839_s3 + $0x48] sm:$0xff] }
  0x39   : > { %v1363_v6 = vld [vmem:[%s1839_s3 + $0x10] sm:$0xff]  ;;  %v1369_v7 = vld [vmem:[%s1839_s3 + $0x40] sm:$0xff]  ;;  %v1362_v8 = vld [vmem:[%s1839_s3 + $0x8] sm:$0xff] }
  0x3a   : > { %v1353_v9 = vld [vmem:[%s1767_s28] sm:$0xff]  ;;  %v1354_v17 = vld [vmem:[%s1767_s28 + $0x8] sm:$0xff]  ;;  %v1355_v25 = vld [vmem:[%s1767_s28 + $0x10] sm:$0xff] }
  0x3b   : > { %501 = vmatpush.bf16.msra.mxu0 %v1339_v10  ;;  %905 = vmatpush.bf16.msra.mxu3 %v1374_v55  ;;  %v1151_v10 = vld [vmem:[%s1633_s9 + $0x70] sm:$0xf]  ;;  %v1356_v37 = vld [vmem:[%s1767_s28 + $0x18] sm:$0xff]  ;;  %v1357_v49 = vld [vmem:[%s1767_s28 + $0x20] sm:$0xff] }
  0x3c   : > { %550 = vmatpush.bf16.msra.mxu1 %v1347_v11  ;;  %856 = vmatpush.bf16.msra.mxu2 %v1366_v58  ;;  %v1336_v11 = vld [vmem:[%s1633_s9 + $0x74] sm:$0xf0]  ;;  %v1358_v61 = vld [vmem:[%s1767_s28 + $0x28] sm:$0xff] }
  0x3f   : > { %502 = vmatpush.bf16.msra.mxu0 %v1338_v12  ;;  %906 = vmatpush.bf16.msra.mxu3 %v1373_v57  ;;  %v1335_v12 = vld [vmem:[%s1633_s9 + $0x74] sm:$0xf] }
  0x40   : > { %551 = vmatpush.bf16.msra.mxu1 %v1346_v13  ;;  %857 = vmatpush.bf16.msra.mxu2 %v1365_v60  ;;  %v1153_v13 = vld [vmem:[%s1633_s9 + $0x78] sm:$0xf0] }
  0x41   : > { %v1156_v16 = vor.u32 %v1335_v12, %v1153_v13 }
  0x43   : > { %503 = vmatpush.bf16.msra.mxu0 %v1337_v14  ;;  %907 = vmatpush.bf16.msra.mxu3 %v1372_v59  ;;  %v1361_v14 = vld [vmem:[%s1839_s3] sm:$0xff] }
  0x44   : > { %552 = vmatpush.bf16.msra.mxu1 %v1345_v15  ;;  %858 = vmatpush.bf16.msra.mxu2 %v1364_v4  ;;  %v1152_v15 = vor.u32 %v1336_v11, %v1151_v10 }
  0x46   : > { %504 = vmatmul.bf16.vlgmr.msra.gmra.mxu0 %v1096_v20 }
  0x47   : > { %553 = vmatmul.bf16.vlgmr.msra.gmra.mxu1 %v1100_v21  ;;  %908 = vmatpush.bf16.msra.mxu3 %v1371_v1 }
  0x48   : > { %859 = vmatpush.bf16.msra.mxu2 %v1363_v6 }
  0x4b   : > { %909 = vmatpush.bf16.msra.mxu3 %v1370_v5 }
  0x4c   : > { %860 = vmatpush.bf16.msra.mxu2 %v1362_v8 }
  0x4f   : > { %910 = vmatpush.bf16.msra.mxu3 %v1369_v7 }
  0x50   : > { %861 = vmatpush.bf16.msra.mxu2 %v1361_v14 }
  0x52   : > { %911 = vmatmul.bf16.vlgmr.msra.gmra.mxu3 %v1353_v9  ;;  %v1359_v9 = vld [vmem:[%s1767_s28 + $0x30] sm:$0xff] }
  0x56   : > { %509 = vmatmul.bf16.gmra.mxu0 %v1104_v26 }
  0x57   : > { %558 = vmatmul.bf16.gmra.mxu1 %v1108_v27 }
  0x62   : > { %916 = vmatmul.bf16.gmra.mxu3 %v1354_v17 }
  0x66   : > { %514 = vmatmul.bf16.gmra.mxu0 %v1112_v32 }
  0x67   : > { %563 = vmatmul.bf16.gmra.mxu1 %v1116_v33 }
  0x72   : > { %921 = vmatmul.bf16.gmra.mxu3 %v1355_v25 }
  0x76   : > { %519 = vmatmul.bf16.gmra.mxu0 %v1120_v38 }
  0x77   : > { %568 = vmatmul.bf16.gmra.mxu1 %v1124_v39 }
  0x82   : > { %926 = vmatmul.bf16.gmra.mxu3 %v1356_v37 }
  0x86   : > { %524 = vmatmul.bf16.gmra.mxu0 %v1128_v44 }
  0x87   : > { %573 = vmatmul.bf16.gmra.mxu1 %v1132_v45 }
  0x92   : > { %931 = vmatmul.bf16.gmra.mxu3 %v1357_v49 }
  0x96   : > { %529 = vmatmul.bf16.gmra.mxu0 %v1136_v53 }
  0x97   : > { %578 = vmatmul.bf16.gmra.mxu1 %v1140_v54 }
  0xa2   : > { %936 = vmatmul.bf16.gmra.mxu3 %v1358_v61 }
  0xa6   : > { %534 = vmatmul.bf16.gmra.mxu0 %v1144_v2 }
  0xa7   : > { %583 = vmatmul.bf16.gmra.mxu1 %v1148_v3 }
  0xb2   : > { %941 = vmatmul.bf16.gmra.mxu3 %v1359_v9 }
  0xb6   : > { %539 = vmatmul.bf16.gmra.mxu0 %v1152_v15 }
  0xb7   : > { %588 = vmatmul.bf16.gmra.mxu1 %v1156_v16 }
  0xc3   : > { %v505_v18 = vpop.f32.mrf.mxu0 }
  0xc4   : > { %v554_v19 = vpop.f32.mrf.mxu1 }
  0xc5   : > { %v555_v20 = vadd.f32 %v554_v19, %v505_v18 }
  0xc7   : > { %v594_v23 = vpack.c.bf16 %v555_v20, %v555_v20 }
  0xc9   : > { %v642_v27 = vunpack.c.l.b16 %v594_v23 }
  0xcb   : > { %v507_v21 = vpop.f32.mrf.mxu0 }
  0xcc   : > { %v556_v22 = vpop.f32.mrf.mxu1 }
  0xcd   : > { %v557_v24 = vadd.f32 %v556_v22, %v507_v21  ;;  %v1360_v21 = vld [vmem:[%s1767_s28 + $0x38] sm:$0xff] }
  0xce   : > { %946 = vmatmul.bf16.gmra.mxu3 %v1360_v21 }
  0xcf   : > { %v595_v26 = vpack.c.bf16 %v557_v24, %v557_v24 }
  0xd1   : > { %v643_v28 = vunpack.c.l.b16 %v595_v26 }
  0xd3   : > { %v658_v29 = vpack.c.b16 %v643_v28, %v642_v27  ;;  %v510_v30 = vpop.f32.mrf.mxu0 }
  0xd4   : > { %v559_v31 = vpop.f32.mrf.mxu1 }
  0xd5   : > { %862 = vmatmul.bf16.vlgmr.msra.gmra.mxu2 %v658_v29  ;;  %v560_v32 = vadd.f32 %v559_v31, %v510_v30 }
  0xd7   : > { %v596_v35 = vpack.c.bf16 %v560_v32, %v560_v32 }
  0xd9   : > { %v644_v39 = vunpack.c.l.b16 %v596_v35 }
  0xdb   : > { %v512_v33 = vpop.f32.mrf.mxu0 }
  0xdc   : > { %v561_v34 = vpop.f32.mrf.mxu1 }
  0xdd   : > { %v562_v36 = vadd.f32 %v561_v34, %v512_v33 }
  0xdf   : > { %v597_v38 = vpack.c.bf16 %v562_v36, %v562_v36 }
  0xe1   : > { %v645_v40 = vunpack.c.l.b16 %v597_v38 }
  0xe3   : > { %v659_v41 = vpack.c.b16 %v645_v40, %v644_v39  ;;  %v515_v42 = vpop.f32.mrf.mxu0  ;;  %v912_v40 = vpop.f32.mrf.mxu3 }
  0xe4   : > { %v564_v43 = vpop.f32.mrf.mxu1 }
  0xe5   : > { %867 = vmatmul.bf16.gmra.mxu2 %v659_v41  ;;  %v565_v44 = vadd.f32 %v564_v43, %v515_v42 }
  0xe7   : > { %v598_v47 = vpack.c.bf16 %v565_v44, %v565_v44 }
  0xe9   : > { %v646_v51 = vunpack.c.l.b16 %v598_v47 }
  0xeb   : > { %v517_v45 = vpop.f32.mrf.mxu0  ;;  %v914_v49 = vpop.f32.mrf.mxu3 }
  0xec   : > { %v566_v46 = vpop.f32.mrf.mxu1 }
  0xed   : > { %v567_v48 = vadd.f32 %v566_v46, %v517_v45 }
  0xef   : > { %v599_v50 = vpack.c.bf16 %v567_v48, %v567_v48 }
  0xf1   : > { %v647_v52 = vunpack.c.l.b16 %v599_v50 }
  0xf3   : > { %v660_v53 = vpack.c.b16 %v647_v52, %v646_v51  ;;  %v520_v54 = vpop.f32.mrf.mxu0  ;;  %v917_v50 = vpop.f32.mrf.mxu3  ;;  %v1790_v52 = vld [vmem:[%s1840_s4] ss:$0 sm:$0xff] }
  0xf4   : > { %v569_v55 = vpop.f32.mrf.mxu1 }
  0xf5   : > { %872 = vmatmul.bf16.gmra.mxu2 %v660_v53  ;;  %v570_v56 = vadd.f32 %v569_v55, %v520_v54 }
  0xf7   : > { %v600_v59 = vpack.c.bf16 %v570_v56, %v570_v56 }
  0xf9   : > { %v648_v63 = vunpack.c.l.b16 %v600_v59 }
  0xfb   : > { %v522_v57 = vpop.f32.mrf.mxu0  ;;  %v919_v53 = vpop.f32.mrf.mxu3 }
  0xfc   : > { %v571_v58 = vpop.f32.mrf.mxu1 }
  0xfd   : > { %v572_v60 = vadd.f32 %v571_v58, %v522_v57 }
  0xff   : > { %v601_v62 = vpack.c.bf16 %v572_v60, %v572_v60 }
 0x101   : > { %v649_v0 = vunpack.c.l.b16 %v601_v62 }
 0x103   : > { %v661_v1 = vpack.c.b16 %v649_v0, %v648_v63  ;;  %v525_v2 = vpop.f32.mrf.mxu0  ;;  %v922_v59 = vpop.f32.mrf.mxu3 }
 0x104   : > { %v574_v3 = vpop.f32.mrf.mxu1 }
 0x105   : > { %877 = vmatmul.bf16.gmra.mxu2 %v661_v1  ;;  %v575_v4 = vadd.f32 %v574_v3, %v525_v2 }
 0x107   : > { %v602_v7 = vpack.c.bf16 %v575_v4, %v575_v4 }
 0x109   : > { %v650_v11 = vunpack.c.l.b16 %v602_v7 }
 0x10b   : > { %v527_v5 = vpop.f32.mrf.mxu0  ;;  %v924_v1 = vpop.f32.mrf.mxu3 }
 0x10c   : > { %v576_v6 = vpop.f32.mrf.mxu1 }
 0x10d   : > { %v577_v8 = vadd.f32 %v576_v6, %v527_v5 }
 0x10f   : > { %v603_v10 = vpack.c.bf16 %v577_v8, %v577_v8 }
 0x111   : > { %v651_v12 = vunpack.c.l.b16 %v603_v10 }
 0x113   : > { %v662_v13 = vpack.c.b16 %v651_v12, %v650_v11  ;;  %v530_v14 = vpop.f32.mrf.mxu0  ;;  %v927_v10 = vpop.f32.mrf.mxu3 }
 0x114   : > { %v579_v15 = vpop.f32.mrf.mxu1 }
 0x115   : > { %882 = vmatmul.bf16.gmra.mxu2 %v662_v13  ;;  %v580_v16 = vadd.f32 %v579_v15, %v530_v14 }
 0x117   : > { %v604_v19 = vpack.c.bf16 %v580_v16, %v580_v16 }
 0x119   : > { %v652_v23 = vunpack.c.l.b16 %v604_v19 }
 0x11b   : > { %v532_v17 = vpop.f32.mrf.mxu0  ;;  %v929_v15 = vpop.f32.mrf.mxu3 }
 0x11c   : > { %v581_v18 = vpop.f32.mrf.mxu1 }
 0x11d   : > { %v582_v20 = vadd.f32 %v581_v18, %v532_v17 }
 0x11f   : > { %v605_v22 = vpack.c.bf16 %v582_v20, %v582_v20 }
 0x121   : > { %v653_v24 = vunpack.c.l.b16 %v605_v22 }
 0x123   : > { %v663_v25 = vpack.c.b16 %v653_v24, %v652_v23  ;;  %v535_v26 = vpop.f32.mrf.mxu0  ;;  %v932_v21 = vpop.f32.mrf.mxu3 }
 0x124   : > { %v584_v27 = vpop.f32.mrf.mxu1 }
 0x125   : > { %887 = vmatmul.bf16.gmra.mxu2 %v663_v25  ;;  %v585_v28 = vadd.f32 %v584_v27, %v535_v26 }
 0x127   : > { %v606_v31 = vpack.c.bf16 %v585_v28, %v585_v28 }
 0x129   : > { %v654_v34 = vunpack.c.l.b16 %v606_v31 }
 0x12b   : > { %v537_v29 = vpop.f32.mrf.mxu0 }
 0x12c   : > { %v586_v30 = vpop.f32.mrf.mxu1 }
 0x12d   : > { %v587_v32 = vadd.f32 %v586_v30, %v537_v29  ;;  %v934_v29 = vpop.f32.mrf.mxu3 }
 0x12f   : > { %v607_v33 = vpack.c.bf16 %v587_v32, %v587_v32 }
 0x131   : > { %v655_v35 = vunpack.c.l.b16 %v607_v33 }
 0x133   : > { %v664_v36 = vpack.c.b16 %v655_v35, %v654_v34  ;;  %v540_v37 = vpop.f32.mrf.mxu0 }
 0x134   : > { %v589_v38 = vpop.f32.mrf.mxu1 }
 0x135   : > { %892 = vmatmul.bf16.gmra.mxu2 %v664_v36  ;;  %v590_v39 = vadd.f32 %v589_v38, %v540_v37  ;;  %v937_v34 = vpop.f32.mrf.mxu3 }
 0x137   : > { %v608_v43 = vpack.c.bf16 %v590_v39, %v590_v39 }
 0x139   : > { %v656_v46 = vunpack.c.l.b16 %v608_v43 }
 0x13b   : > { %v542_v41 = vpop.f32.mrf.mxu0 }
 0x13c   : > { %v591_v42 = vpop.f32.mrf.mxu1 }
 0x13d   : > { %v592_v44 = vadd.f32 %v591_v42, %v542_v41  ;;  %v939_v42 = vpop.f32.mrf.mxu3 }
 0x13f   : > { %v609_v45 = vpack.c.bf16 %v592_v44, %v592_v44 }
 0x141   : > { %v657_v47 = vunpack.c.l.b16 %v609_v45 }
 0x143   : > { %v665_v48 = vpack.c.b16 %v657_v47, %v656_v46 }
 0x145   : > { %897 = vmatmul.bf16.gmra.mxu2 %v665_v48  ;;  %v942_v48 = vpop.f32.mrf.mxu3 }
 0x158   : > { %v863_v51 = vpop.f32.mrf.mxu2 }
 0x159   : > { %v864_v54 = vadd.f32 %v1790_v52, %v863_v51 }
 0x15b   : > { %v913_v56 = vadd.f32 %v912_v40, %v864_v54 }
 0x15d   : > { %v952_v60 = vmax.f32 %v913_v56, 0.0 }
 0x160   : > { %v865_v55 = vpop.f32.mrf.mxu2 }
 0x161   : > { %v866_v57 = vadd.f32 %v1790_v52, %v865_v55  ;;  %v944_v55 = vpop.f32.mrf.mxu3 }
 0x163   : > { %v915_v58 = vadd.f32 %v914_v49, %v866_v57 }
 0x165   : > { %v953_v61 = vmax.f32 %v915_v58, 0.0 }
 0x167   : > { %v1380_v62 = vpack.c.bf16 %v953_v61, %v952_v60 }
 0x168   : > { %v868_v63 = vpop.f32.mrf.mxu2 }
 0x169   : > { %1381 = vst [vmem:[%s1799_s21] sm:$0xff] %v1380_v62   ;;  %v869_v0 = vadd.f32 %v1790_v52, %v868_v63  ;;  %v947_v63 = vpop.f32.mrf.mxu3 }
 0x16b   : > { %v918_v3 = vadd.f32 %v917_v50, %v869_v0 }
 0x16d   : > { %v954_v6 = vmax.f32 %v918_v3, 0.0 }
 0x170   : > { %v870_v2 = vpop.f32.mrf.mxu2 }
 0x171   : > { %v871_v4 = vadd.f32 %v1790_v52, %v870_v2 }
 0x173   : > { %v920_v5 = vadd.f32 %v919_v53, %v871_v4 }
 0x175   : > { %v955_v7 = vmax.f32 %v920_v5, 0.0  ;;  %v949_v5 = vpop.f32.mrf.mxu3 }
 0x177   : > { %v1385_v8 = vpack.c.bf16 %v955_v7, %v954_v6 }
 0x178   : > { %v873_v9 = vpop.f32.mrf.mxu2 }
 0x179   : > { %1417 = vst [vmem:[%s1799_s21 + $0x8] sm:$0xff] %v1385_v8   ;;  %v874_v11 = vadd.f32 %v1790_v52, %v873_v9 }
 0x17b   : > { %v923_v13 = vadd.f32 %v922_v59, %v874_v11 }
 0x17d   : > { %v956_v17 = vmax.f32 %v923_v13, 0.0 }
 0x180   : > { %v875_v12 = vpop.f32.mrf.mxu2 }
 0x181   : > { %v876_v14 = vadd.f32 %v1790_v52, %v875_v12 }
 0x183   : > { %v925_v16 = vadd.f32 %v924_v1, %v876_v14 }
 0x185   : > { %v957_v18 = vmax.f32 %v925_v16, 0.0 }
 0x187   : > { %v1390_v19 = vpack.c.bf16 %v957_v18, %v956_v17 }
 0x188   : > { %v878_v20 = vpop.f32.mrf.mxu2 }
 0x189   : > { %1418 = vst [vmem:[%s1799_s21 + $0x10] sm:$0xff] %v1390_v19   ;;  %v879_v22 = vadd.f32 %v1790_v52, %v878_v20 }
 0x18b   : > { %v928_v24 = vadd.f32 %v927_v10, %v879_v22 }
 0x18d   : > { %v958_v27 = vmax.f32 %v928_v24, 0.0 }
 0x190   : > { %v880_v23 = vpop.f32.mrf.mxu2 }
 0x191   : > { %v881_v25 = vadd.f32 %v1790_v52, %v880_v23 }
 0x193   : > { %v930_v26 = vadd.f32 %v929_v15, %v881_v25 }
 0x195   : > { %v959_v28 = vmax.f32 %v930_v26, 0.0 }
 0x197   : > { %v1395_v30 = vpack.c.bf16 %v959_v28, %v958_v27 }
 0x198   : > { %v883_v31 = vpop.f32.mrf.mxu2 }
 0x199   : > { %1419 = vst [vmem:[%s1799_s21 + $0x18] sm:$0xff] %v1395_v30   ;;  %v884_v32 = vadd.f32 %v1790_v52, %v883_v31 }
 0x19b   : > { %v933_v35 = vadd.f32 %v932_v21, %v884_v32 }
 0x19d   : > { %v960_v38 = vmax.f32 %v933_v35, 0.0 }
 0x1a0   : > { %v885_v33 = vpop.f32.mrf.mxu2 }
 0x1a1   : > { %v886_v36 = vadd.f32 %v1790_v52, %v885_v33 }
 0x1a3   : > { %v935_v37 = vadd.f32 %v934_v29, %v886_v36 }
 0x1a5   : > { %v961_v39 = vmax.f32 %v935_v37, 0.0 }
 0x1a7   : > { %v1400_v40 = vpack.c.bf16 %v961_v39, %v960_v38 }
 0x1a8   : > { %v888_v41 = vpop.f32.mrf.mxu2 }
 0x1a9   : > { %1420 = vst [vmem:[%s1799_s21 + $0x20] sm:$0xff] %v1400_v40   ;;  %v889_v43 = vadd.f32 %v1790_v52, %v888_v41 }
 0x1ab   : > { %v938_v45 = vadd.f32 %v937_v34, %v889_v43 }
 0x1ad   : > { %v962_v49 = vmax.f32 %v938_v45, 0.0 }
 0x1b0   : > { %v890_v44 = vpop.f32.mrf.mxu2 }
 0x1b1   : > { %v891_v46 = vadd.f32 %v1790_v52, %v890_v44 }
 0x1b3   : > { %v940_v47 = vadd.f32 %v939_v42, %v891_v46 }
 0x1b5   : > { %v963_v50 = vmax.f32 %v940_v47, 0.0 }
 0x1b7   : > { %v1405_v51 = vpack.c.bf16 %v963_v50, %v962_v49 }
 0x1b8   : > { %v893_v53 = vpop.f32.mrf.mxu2 }
 0x1b9   : > { %1421 = vst [vmem:[%s1799_s21 + $0x28] sm:$0xff] %v1405_v51   ;;  %v894_v54 = vadd.f32 %v1790_v52, %v893_v53 }
 0x1bb   : > { %v943_v57 = vadd.f32 %v942_v48, %v894_v54 }
 0x1bd   : > { %v964_v60 = vmax.f32 %v943_v57, 0.0 }
 0x1c0   : > { %v895_v56 = vpop.f32.mrf.mxu2 }
 0x1c1   : > { %v896_v58 = vadd.f32 %v1790_v52, %v895_v56 }
 0x1c3   : > { %v945_v59 = vadd.f32 %v944_v55, %v896_v58 }
 0x1c5   : > { %v965_v61 = vmax.f32 %v945_v59, 0.0 }
 0x1c7   : > { %v1410_v62 = vpack.c.bf16 %v965_v61, %v964_v60 }
 0x1c8   : > { %v898_v0 = vpop.f32.mrf.mxu2 }
 0x1c9   : > { %1422 = vst [vmem:[%s1799_s21 + $0x30] sm:$0xff] %v1410_v62   ;;  %v899_v1 = vadd.f32 %v1790_v52, %v898_v0 }
 0x1cb   : > { %v948_v3 = vadd.f32 %v947_v63, %v899_v1 }
 0x1cd   : > { %v966_v7 = vmax.f32 %v948_v3, 0.0 }
 0x1d0   : > { %v900_v2 = vpop.f32.mrf.mxu2 }
 0x1d1   : > { %v901_v4 = vadd.f32 %v1790_v52, %v900_v2 }
 0x1d3   : > { %v950_v6 = vadd.f32 %v949_v5, %v901_v4 }
 0x1d5   : > { %v967_v8 = vmax.f32 %v950_v6, 0.0 }
 0x1d7   : > { %v1415_v9 = vpack.c.bf16 %v967_v8, %v966_v7 }
 0x1d9   : > { %1423 = vst [vmem:[%s1799_s21 + $0x38] sm:$0xff] %v1415_v9  }
 0x1da PF: > { %p15_p7 = scmp.ge.s32.totalorder %s1584_s23, 4   ;;  %s1845_s18 = smov %s1522_s19 }
 0x1db   : > { %s1846_s19 = smov %s1526_s20  ;;  %s1847_s20 = smov %s1594_s26 }
 0x1dc   : > { %s1848_s21 = smov %s1584_s23  ;;  %17 = sbr.rel (!%p15_p7) target bundleno = 3 (0x3), region = 83 }
 0x1e1   :  { %1022 = vsyncpa [#allocation3], 1 }
 0x1e2   :  { %1024 = vsyncpa [#allocation3 + $0x1], 1 }

// kernel: sage_forward.5
= control target key start
LH: loop header
LB: loop body
LE: loop exit
PB: predicated region body
PF: predicated region fallthrough
CT: control target
= control target key end

     0   :  { %10 = vsyncpa [#allocation3], 0  ;;  %s1808_s0 = inlined_call_operand.hbm [shape: bf16[256,256], index: 0, kind: input, shape index: {}]   ;;  %s1809_s1 = inlined_call_operand.vmem [shape: bf16[256,128], index: 1, kind: input, shape index: {}, may-alias: {1,2}]   ;;  %s1810_s2 = inlined_call_operand.vmem [shape: bf16[256,128], index: 2, kind: input, shape index: {}, may-alias: {1,2}]   ;;  %s1811_s3 = inlined_call_operand.hbm [shape: bf16[256,128], index: 3, kind: input, shape index: {}]   ;;  %s1812_s4 = inlined_call_operand.vmem [shape: f32[1,128], index: 4, kind: input, shape index: {}]   ;;  %s1813_s5 = inlined_call_operand.vmem [shape: f32[256,128], index: 5, kind: output, shape index: {}]  }
   0x1   :  { %12 = vsyncpa [#allocation3 + $0x1], 0 }
   0x2   :  { %13 = vsyncpa [#allocation5], 0  ;;  %s1564_s18 = smov 0   ;;  %s1566_s19 = smov 0  }
   0x3   :  { %s1568_s20 = smov 0   ;;  %s1570_s21 = smov 0  }
   0x4 LB: > { %s1074_s22 = sadd.s32 4294967295, %s1527_s21   ;;  %p39_p0 = scmp.ne.s32.totalorder %s1519_s19, %s1515_s18  ;;  %s1527_s21 = sphi %s1570_s21, %s1821_s21   ;;  %s1523_s20 = sphi %s1568_s20, %s1820_s20   ;;  %s1519_s19 = sphi %s1566_s19, %s1819_s19   ;;  %s1515_s18 = sphi %s1564_s18, %s1818_s18  }
   0x5   : > { %p1586_p1 = scmp.eq.s32.totalorder %s1074_s22, 0  ;;  %p1076_p2 = scmp.ge.s32.totalorder %s1527_s21, 1 }
   0x6   : > { %p165_p3 = scmp.lt.s32.totalorder %s1527_s21, 3  ;;  %s179_s27 = sshll.u32 %s1811_s3, 4  ;;  %s180_s27 = int_to_ptr.hbm [resolvable:$true] %s179_s27 }
   0x7   : > { %p1594_p4 = por %p1586_p1, %p39_p0  ;;  %s1529_s29 = smov [#allocation4]  }
   0x8   : > { %p1601_p5 = pnand %p1076_p2, %p165_p3  ;;  %s181_s30 = sshll.u32 %s1529_s29, 4  ;;  %s182_s30 = int_to_ptr.vmem [resolvable:$true] %s181_s30 }
   0x9   : > { %s1610_s6 = sadd.s32 1, %s1527_s21   ;;  %s1530_s7 = smov 64  }
   0xa   : > { %p1380_p6 = pneg %p1601_p5  ;;  %s1531_s8 = smov 4  }
   0xb   : > { %s23_s9 = ssub.s32 %s1527_s21, %s1610_s6  ;;  %s26_s10 = sadd.s32 1, %s1523_s20 }
   0xc   : > { %p1381_p7 = pnand %p1380_p6, %p1586_p1  ;;  %p24_p8 = scmp.eq.s32.totalorder %s23_s9, 0 }
   0xd   : > { %p33_p9 = scmp.ne.s32.totalorder %s1523_s20, %s1519_s19  ;;  %p34_p10 = scmp.eq.s32.totalorder %s1527_s21, 0 }
   0xe   : > { %1383 = dma.hbm_to_vmem [thread:$0]  (!%p1381_p7), %s180_s27, 2048, %s182_s30, [#allocation5], %s1530_s7, %s1530_s7, %s1531_s8  }
   0xf   : > { %p1389_p11 = scmp.lt.s32.totalorder %s1527_s21, 2  ;;  %p35_p12 = por %p34_p10, %p33_p9 }
  0x10   : > { %s1620_s11 = scalar_select %p24_p8, %s1523_s20, %s26_s10  }
  0x11   : > { %s198_s12 = sand.u32 1, %s1523_s20   ;;  %s1317_s14 = sshll.u32 %s1527_s21, 7 }
  0x12   : > { %s1079_s13 = sshll.u32 %s198_s12, 7  ;;  %s208_s17 = scalar_lea.hbm %s1808_s0, %s1317_s14 }
  0x13   : > { %s202_s18 = scalar_lea.vmem [#allocation2], %s1079_s13  ;;  %s209_s26 = sshll.u32 %s208_s17, 4  ;;  %s210_s26 = int_to_ptr.hbm [resolvable:$true] %s209_s26 }
  0x14   : > { %s211_s25 = sshll.u32 %s202_s18, 4  ;;  %p1627_p13 = pnand %p1389_p11, %p35_p12  ;;  %s212_s25 = int_to_ptr.vmem [resolvable:$true] %s211_s25 }
  0x15   : > { %s199_s29 = scalar_lea.sflag [#allocation3], %s198_s12  ;;  %s1459_s30 = sshra.s32 %s210_s26, 4  ;;  %s1460_s30 = int_to_ptr.hbm [resolvable:$true] %s1459_s30 }
  0x16   : > { %s1461_s7 = scalar_lea.hbm %s1460_s30, 128  ;;  %p1463_p2 = pneg %p1627_p13 }
  0x17   : > { %p1462_p0 = scmp.ne.s32.totalorder %s1460_s30, %s1461_s7  ;;  %s1466_s10 = scalar_lea.hbm %s1808_s0, 256 }
  0x18   : > { %p1467_p7 = scmp.lt.s32.totalorder %s1460_s30, %s1808_s0  ;;  %p1468_p8 = scmp.lt.s32.totalorder %s1466_s10, %s1461_s7 }
  0x19   : > { %p1464_p3 = pnand %p1463_p2, %p1462_p0 }
  0x1a   : > { %p1469_p9 = por %p1468_p8, %p1467_p7 }
  0x1b   : > { %p1465_p6 = pneg %p1464_p3 }
  0x1d   : > { %p1470_p10 = pnand %p1469_p9, %p1465_p6 }
  0x1f   : > { %1473 = shalt.err (!%p1470_p10)
}
  0x20   : > { %s1532_s12 = smov 128   ;;  %s1533_s15 = smov 8  }
  0x21   : > { %1387 = dma.hbm_to_vmem [thread:$0]  (!%p1627_p13), %s210_s26, 2048, %s212_s25, %s199_s29, %s1532_s12, %s1532_s12, %s1533_s15  }
  0x22   : > { %232 = sbr.rel (%p1601_p5) target bundleno = 474 (0x1da), region = 40  ;;  %s234_s16 = sand.u32 (!%p1601_p5), 1, %s1519_s19  }
  0x23   : > { %s1084_s17 = sshll.u32 (!%p1601_p5), %s234_s16, 7  ;;  %s235_s18 = scalar_lea.sflag (!%p1601_p5), [#allocation3], %s234_s16 }
  0x24   : > { %s1644_s8 = scalar_lea.vmem (!%p1601_p5), [#allocation2], %s1084_s17 }
  0x27   : > { %1506 = dma.done.wait (%p1594_p4), %s235_s18, 2048  }
  0x28   : > { %1508 = vsyncadd (%p1594_p4), %s235_s18, 4294965248 }
  0x29   : > { %1510 = dma.done.wait (%p1586_p1), [#allocation5], 2048  }
  0x2a   : > { %1512 = vsyncadd (%p1586_p1), [#allocation5], 4294965248  ;;  %v1341_v0 = vld [vmem:[%s1809_s1 + $0x38] sm:$0xff]  ;;  %v1340_v2 = vld [vmem:[%s1809_s1 + $0x30] sm:$0xff]  ;;  %s1086_s15 = sshll.u32 %s1074_s22, 4 }
  0x2b   : > { %v1349_v1 = vld [vmem:[%s1809_s1 + $0x78] sm:$0xff]  ;;  %513 = vmatpush.bf16.msra.mxu0 %v1341_v0  ;;  %v1348_v3 = vld [vmem:[%s1809_s1 + $0x70] sm:$0xff]  ;;  %v1339_v4 = vld [vmem:[%s1809_s1 + $0x28] sm:$0xff]  ;;  %p278_p1 = scmp.lt.s32.totalorder %s1086_s15, 31 }
  0x2c   : > { %562 = vmatpush.bf16.msra.mxu1 %v1349_v1  ;;  %v1347_v5 = vld [vmem:[%s1809_s1 + $0x68] sm:$0xff]  ;;  %v1338_v6 = vld [vmem:[%s1809_s1 + $0x20] sm:$0xff]  ;;  %v1337_v8 = vld [vmem:[%s1809_s1 + $0x18] sm:$0xff] }
  0x2d   : > { %v1346_v7 = vld [vmem:[%s1809_s1 + $0x60] sm:$0xff]  ;;  %v1345_v9 = vld [vmem:[%s1809_s1 + $0x58] sm:$0xff]  ;;  %v1336_v10 = vld [vmem:[%s1809_s1 + $0x10] sm:$0xff]  ;;  %s1823_s15 = smov (!%p278_p1, %s1086_s15), 31 }
  0x2e   : > { %v1344_v11 = vld [vmem:[%s1809_s1 + $0x50] sm:$0xff]  ;;  %v1335_v12 = vld [vmem:[%s1809_s1 + $0x8] sm:$0xff]  ;;  %v1334_v14 = vld [vmem:[%s1809_s1] sm:$0xff]  ;;  %s1087_s21 = sshll.u32 %s1823_s15, 2  ;;  %s1089_s28 = sshll.u32 %s1823_s15, 3 }
  0x2f   : > { %514 = vmatpush.bf16.msra.mxu0 %v1340_v2  ;;  %v1343_v13 = vld [vmem:[%s1809_s1 + $0x48] sm:$0xff]  ;;  %v1342_v15 = vld [vmem:[%s1809_s1 + $0x40] sm:$0xff]  ;;  %v1100_v22 = vld [vmem:[%s1644_s8 + $0x10] sm:$0xf]  ;;  %s1738_s17 = scalar_lea.vmem %s1810_s2, %s1087_s21  ;;  %s1762_s27 = scalar_lea.vmem %s1813_s5, %s1089_s28 }
  0x30   : > { %563 = vmatpush.bf16.msra.mxu1 %v1348_v3  ;;  %v1092_v16 = vld [vmem:[%s1644_s8] sm:$0xf]  ;;  %v1319_v17 = vld [vmem:[%s1644_s8 + $0x4] sm:$0xf0]  ;;  %v1318_v18 = vld [vmem:[%s1644_s8 + $0x4] sm:$0xf] }
  0x31   : > { %v1094_v19 = vld [vmem:[%s1644_s8 + $0x8] sm:$0xf0]  ;;  %v1093_v20 = vor.u32 %v1319_v17, %v1092_v16  ;;  %v1321_v23 = vld [vmem:[%s1644_s8 + $0x14] sm:$0xf0]  ;;  %v1320_v24 = vld [vmem:[%s1644_s8 + $0x14] sm:$0xf] }
  0x32   : > { %v1097_v21 = vor.u32 %v1318_v18, %v1094_v19  ;;  %v1102_v25 = vld [vmem:[%s1644_s8 + $0x18] sm:$0xf0]  ;;  %v1101_v26 = vor.u32 %v1321_v23, %v1100_v22  ;;  %v1108_v28 = vld [vmem:[%s1644_s8 + $0x20] sm:$0xf]  ;;  %v1323_v29 = vld [vmem:[%s1644_s8 + $0x24] sm:$0xf0] }
  0x33   : > { %515 = vmatpush.bf16.msra.mxu0 %v1339_v4  ;;  %v1105_v27 = vor.u32 %v1320_v24, %v1102_v25  ;;  %v1322_v30 = vld [vmem:[%s1644_s8 + $0x24] sm:$0xf]  ;;  %v1110_v31 = vld [vmem:[%s1644_s8 + $0x28] sm:$0xf0]  ;;  %v1109_v32 = vor.u32 %v1323_v29, %v1108_v28  ;;  %v1116_v34 = vld [vmem:[%s1644_s8 + $0x30] sm:$0xf] }
  0x34   : > { %564 = vmatpush.bf16.msra.mxu1 %v1347_v5  ;;  %v1113_v33 = vor.u32 %v1322_v30, %v1110_v31  ;;  %v1325_v35 = vld [vmem:[%s1644_s8 + $0x34] sm:$0xf0]  ;;  %v1324_v36 = vld [vmem:[%s1644_s8 + $0x34] sm:$0xf]  ;;  %v1118_v37 = vld [vmem:[%s1644_s8 + $0x38] sm:$0xf0] }
  0x35   : > { %v1117_v38 = vor.u32 %v1325_v35, %v1116_v34  ;;  %v1121_v39 = vor.u32 %v1324_v36, %v1118_v37  ;;  %v1124_v40 = vld [vmem:[%s1644_s8 + $0x40] sm:$0xf]  ;;  %v1327_v41 = vld [vmem:[%s1644_s8 + $0x44] sm:$0xf0]  ;;  %v1326_v42 = vld [vmem:[%s1644_s8 + $0x44] sm:$0xf] }
  0x36   : > { %v1126_v43 = vld [vmem:[%s1644_s8 + $0x48] sm:$0xf0]  ;;  %v1125_v44 = vor.u32 %v1327_v41, %v1124_v40  ;;  %v1373_v46 = vld [vmem:[#allocation4 + $0x78] sm:$0xff]  ;;  %v1372_v48 = vld [vmem:[#allocation4 + $0x70] sm:$0xff] }
  0x37   : > { %516 = vmatpush.bf16.msra.mxu0 %v1338_v6  ;;  %v1129_v45 = vor.u32 %v1326_v42, %v1126_v43  ;;  %v1365_v47 = vld [vmem:[#allocation4 + $0x38] sm:$0xff]  ;;  %920 = vmatpush.bf16.msra.mxu3 %v1373_v46  ;;  %v1132_v49 = vld [vmem:[%s1644_s8 + $0x50] sm:$0xf]  ;;  %v1328_v51 = vld [vmem:[%s1644_s8 + $0x54] sm:$0xf] }
  0x38   : > { %565 = vmatpush.bf16.msra.mxu1 %v1346_v7  ;;  %871 = vmatpush.bf16.msra.mxu2 %v1365_v47  ;;  %v1329_v50 = vld [vmem:[%s1644_s8 + $0x54] sm:$0xf0]  ;;  %v1134_v52 = vld [vmem:[%s1644_s8 + $0x58] sm:$0xf0]  ;;  %v1371_v55 = vld [vmem:[#allocation4 + $0x68] sm:$0xff] }
  0x39   : > { %v1133_v53 = vor.u32 %v1329_v50, %v1132_v49  ;;  %v1137_v54 = vor.u32 %v1328_v51, %v1134_v52  ;;  %v1364_v56 = vld [vmem:[#allocation4 + $0x30] sm:$0xff]  ;;  %v1370_v57 = vld [vmem:[#allocation4 + $0x60] sm:$0xff]  ;;  %v1363_v58 = vld [vmem:[#allocation4 + $0x28] sm:$0xff] }
  0x3a   : > { %v1369_v59 = vld [vmem:[#allocation4 + $0x58] sm:$0xff]  ;;  %v1362_v60 = vld [vmem:[#allocation4 + $0x20] sm:$0xff]  ;;  %v1331_v62 = vld [vmem:[%s1644_s8 + $0x64] sm:$0xf0] }
  0x3b   : > { %517 = vmatpush.bf16.msra.mxu0 %v1337_v8  ;;  %921 = vmatpush.bf16.msra.mxu3 %v1372_v48  ;;  %v1140_v61 = vld [vmem:[%s1644_s8 + $0x60] sm:$0xf]  ;;  %v1330_v63 = vld [vmem:[%s1644_s8 + $0x64] sm:$0xf]  ;;  %v1142_v0 = vld [vmem:[%s1644_s8 + $0x68] sm:$0xf0] }
  0x3c   : > { %566 = vmatpush.bf16.msra.mxu1 %v1345_v9  ;;  %872 = vmatpush.bf16.msra.mxu2 %v1364_v56  ;;  %v1368_v1 = vld [vmem:[#allocation4 + $0x50] sm:$0xff]  ;;  %v1141_v2 = vor.u32 %v1331_v62, %v1140_v61  ;;  %v1145_v3 = vor.u32 %v1330_v63, %v1142_v0  ;;  %v1361_v4 = vld [vmem:[#allocation4 + $0x18] sm:$0xff]  ;;  %v1367_v5 = vld [vmem:[#allocation4 + $0x48] sm:$0xff] }
  0x3d   : > { %v1360_v6 = vld [vmem:[#allocation4 + $0x10] sm:$0xff]  ;;  %v1366_v7 = vld [vmem:[#allocation4 + $0x40] sm:$0xff]  ;;  %v1359_v8 = vld [vmem:[#allocation4 + $0x8] sm:$0xff] }
  0x3e   : > { %v1350_v9 = vld [vmem:[%s1738_s17] sm:$0xff]  ;;  %v1351_v17 = vld [vmem:[%s1738_s17 + $0x8] sm:$0xff]  ;;  %v1352_v25 = vld [vmem:[%s1738_s17 + $0x10] sm:$0xff] }
  0x3f   : > { %518 = vmatpush.bf16.msra.mxu0 %v1336_v10  ;;  %922 = vmatpush.bf16.msra.mxu3 %v1371_v55  ;;  %v1148_v10 = vld [vmem:[%s1644_s8 + $0x70] sm:$0xf]  ;;  %v1353_v37 = vld [vmem:[%s1738_s17 + $0x18] sm:$0xff]  ;;  %v1354_v49 = vld [vmem:[%s1738_s17 + $0x20] sm:$0xff] }
  0x40   : > { %567 = vmatpush.bf16.msra.mxu1 %v1344_v11  ;;  %873 = vmatpush.bf16.msra.mxu2 %v1363_v58  ;;  %v1333_v11 = vld [vmem:[%s1644_s8 + $0x74] sm:$0xf0]  ;;  %v1355_v61 = vld [vmem:[%s1738_s17 + $0x28] sm:$0xff] }
  0x43   : > { %519 = vmatpush.bf16.msra.mxu0 %v1335_v12  ;;  %923 = vmatpush.bf16.msra.mxu3 %v1370_v57  ;;  %v1332_v12 = vld [vmem:[%s1644_s8 + $0x74] sm:$0xf] }
  0x44   : > { %568 = vmatpush.bf16.msra.mxu1 %v1343_v13  ;;  %874 = vmatpush.bf16.msra.mxu2 %v1362_v60  ;;  %v1150_v13 = vld [vmem:[%s1644_s8 + $0x78] sm:$0xf0] }
  0x45   : > { %v1153_v16 = vor.u32 %v1332_v12, %v1150_v13 }
  0x47   : > { %520 = vmatpush.bf16.msra.mxu0 %v1334_v14  ;;  %924 = vmatpush.bf16.msra.mxu3 %v1369_v59  ;;  %v1358_v14 = vld [vmem:[#allocation4] sm:$0xff] }
  0x48   : > { %569 = vmatpush.bf16.msra.mxu1 %v1342_v15  ;;  %875 = vmatpush.bf16.msra.mxu2 %v1361_v4  ;;  %v1149_v15 = vor.u32 %v1333_v11, %v1148_v10 }
  0x4a   : > { %521 = vmatmul.bf16.vlgmr.msra.gmra.mxu0 %v1093_v20 }
  0x4b   : > { %570 = vmatmul.bf16.vlgmr.msra.gmra.mxu1 %v1097_v21  ;;  %925 = vmatpush.bf16.msra.mxu3 %v1368_v1 }
  0x4c   : > { %876 = vmatpush.bf16.msra.mxu2 %v1360_v6 }
  0x4f   : > { %926 = vmatpush.bf16.msra.mxu3 %v1367_v5 }
  0x50   : > { %877 = vmatpush.bf16.msra.mxu2 %v1359_v8 }
  0x53   : > { %927 = vmatpush.bf16.msra.mxu3 %v1366_v7 }
  0x54   : > { %878 = vmatpush.bf16.msra.mxu2 %v1358_v14 }
  0x56   : > { %928 = vmatmul.bf16.vlgmr.msra.gmra.mxu3 %v1350_v9  ;;  %v1356_v9 = vld [vmem:[%s1738_s17 + $0x30] sm:$0xff] }
  0x5a   : > { %526 = vmatmul.bf16.gmra.mxu0 %v1101_v26 }
  0x5b   : > { %575 = vmatmul.bf16.gmra.mxu1 %v1105_v27 }
  0x66   : > { %933 = vmatmul.bf16.gmra.mxu3 %v1351_v17 }
  0x6a   : > { %531 = vmatmul.bf16.gmra.mxu0 %v1109_v32 }
  0x6b   : > { %580 = vmatmul.bf16.gmra.mxu1 %v1113_v33 }
  0x76   : > { %938 = vmatmul.bf16.gmra.mxu3 %v1352_v25 }
  0x7a   : > { %536 = vmatmul.bf16.gmra.mxu0 %v1117_v38 }
  0x7b   : > { %585 = vmatmul.bf16.gmra.mxu1 %v1121_v39 }
  0x86   : > { %943 = vmatmul.bf16.gmra.mxu3 %v1353_v37 }
  0x8a   : > { %541 = vmatmul.bf16.gmra.mxu0 %v1125_v44 }
  0x8b   : > { %590 = vmatmul.bf16.gmra.mxu1 %v1129_v45 }
  0x96   : > { %948 = vmatmul.bf16.gmra.mxu3 %v1354_v49 }
  0x9a   : > { %546 = vmatmul.bf16.gmra.mxu0 %v1133_v53 }
  0x9b   : > { %595 = vmatmul.bf16.gmra.mxu1 %v1137_v54 }
  0xa6   : > { %953 = vmatmul.bf16.gmra.mxu3 %v1355_v61 }
  0xaa   : > { %551 = vmatmul.bf16.gmra.mxu0 %v1141_v2 }
  0xab   : > { %600 = vmatmul.bf16.gmra.mxu1 %v1145_v3 }
  0xb6   : > { %958 = vmatmul.bf16.gmra.mxu3 %v1356_v9 }
  0xba   : > { %556 = vmatmul.bf16.gmra.mxu0 %v1149_v15 }
  0xbb   : > { %605 = vmatmul.bf16.gmra.mxu1 %v1153_v16 }
  0xc7   : > { %v522_v18 = vpop.f32.mrf.mxu0 }
  0xc8   : > { %v571_v19 = vpop.f32.mrf.mxu1 }
  0xc9   : > { %v572_v20 = vadd.f32 %v571_v19, %v522_v18 }
  0xcb   : > { %v611_v23 = vpack.c.bf16 %v572_v20, %v572_v20 }
  0xcd   : > { %v659_v27 = vunpack.c.l.b16 %v611_v23 }
  0xcf   : > { %v524_v21 = vpop.f32.mrf.mxu0 }
  0xd0   : > { %v573_v22 = vpop.f32.mrf.mxu1 }
  0xd1   : > { %v574_v24 = vadd.f32 %v573_v22, %v524_v21  ;;  %v1357_v21 = vld [vmem:[%s1738_s17 + $0x38] sm:$0xff] }
  0xd2   : > { %963 = vmatmul.bf16.gmra.mxu3 %v1357_v21 }
  0xd3   : > { %v612_v26 = vpack.c.bf16 %v574_v24, %v574_v24 }
  0xd5   : > { %v660_v28 = vunpack.c.l.b16 %v612_v26 }
  0xd7   : > { %v675_v29 = vpack.c.b16 %v660_v28, %v659_v27  ;;  %v527_v30 = vpop.f32.mrf.mxu0 }
  0xd8   : > { %v576_v31 = vpop.f32.mrf.mxu1 }
  0xd9   : > { %879 = vmatmul.bf16.vlgmr.msra.gmra.mxu2 %v675_v29  ;;  %v577_v32 = vadd.f32 %v576_v31, %v527_v30 }
  0xdb   : > { %v613_v35 = vpack.c.bf16 %v577_v32, %v577_v32 }
  0xdd   : > { %v661_v39 = vunpack.c.l.b16 %v613_v35 }
  0xdf   : > { %v529_v33 = vpop.f32.mrf.mxu0 }
  0xe0   : > { %v578_v34 = vpop.f32.mrf.mxu1 }
  0xe1   : > { %v579_v36 = vadd.f32 %v578_v34, %v529_v33 }
  0xe3   : > { %v614_v38 = vpack.c.bf16 %v579_v36, %v579_v36 }
  0xe5   : > { %v662_v40 = vunpack.c.l.b16 %v614_v38 }
  0xe7   : > { %v676_v41 = vpack.c.b16 %v662_v40, %v661_v39  ;;  %v532_v42 = vpop.f32.mrf.mxu0  ;;  %v929_v40 = vpop.f32.mrf.mxu3 }
  0xe8   : > { %v581_v43 = vpop.f32.mrf.mxu1 }
  0xe9   : > { %884 = vmatmul.bf16.gmra.mxu2 %v676_v41  ;;  %v582_v44 = vadd.f32 %v581_v43, %v532_v42 }
  0xeb   : > { %v615_v47 = vpack.c.bf16 %v582_v44, %v582_v44 }
  0xed   : > { %v663_v51 = vunpack.c.l.b16 %v615_v47 }
  0xef   : > { %v534_v45 = vpop.f32.mrf.mxu0  ;;  %v931_v49 = vpop.f32.mrf.mxu3 }
  0xf0   : > { %v583_v46 = vpop.f32.mrf.mxu1 }
  0xf1   : > { %v584_v48 = vadd.f32 %v583_v46, %v534_v45 }
  0xf3   : > { %v616_v50 = vpack.c.bf16 %v584_v48, %v584_v48 }
  0xf5   : > { %v664_v52 = vunpack.c.l.b16 %v616_v50 }
  0xf7   : > { %v677_v53 = vpack.c.b16 %v664_v52, %v663_v51  ;;  %v537_v54 = vpop.f32.mrf.mxu0  ;;  %v934_v50 = vpop.f32.mrf.mxu3  ;;  %v1755_v51 = vld [vmem:[%s1812_s4] ss:$0 sm:$0xff] }
  0xf8   : > { %v586_v55 = vpop.f32.mrf.mxu1 }
  0xf9   : > { %889 = vmatmul.bf16.gmra.mxu2 %v677_v53  ;;  %v587_v56 = vadd.f32 %v586_v55, %v537_v54 }
  0xfb   : > { %v617_v59 = vpack.c.bf16 %v587_v56, %v587_v56 }
  0xfd   : > { %v665_v63 = vunpack.c.l.b16 %v617_v59 }
  0xff   : > { %v539_v57 = vpop.f32.mrf.mxu0  ;;  %v936_v54 = vpop.f32.mrf.mxu3 }
 0x100   : > { %v588_v58 = vpop.f32.mrf.mxu1 }
 0x101   : > { %v589_v60 = vadd.f32 %v588_v58, %v539_v57 }
 0x103   : > { %v618_v62 = vpack.c.bf16 %v589_v60, %v589_v60 }
 0x105   : > { %v666_v0 = vunpack.c.l.b16 %v618_v62 }
 0x107   : > { %v678_v1 = vpack.c.b16 %v666_v0, %v665_v63  ;;  %v542_v2 = vpop.f32.mrf.mxu0  ;;  %v939_v59 = vpop.f32.mrf.mxu3 }
 0x108   : > { %v591_v3 = vpop.f32.mrf.mxu1 }
 0x109   : > { %894 = vmatmul.bf16.gmra.mxu2 %v678_v1  ;;  %v592_v4 = vadd.f32 %v591_v3, %v542_v2 }
 0x10b   : > { %v619_v7 = vpack.c.bf16 %v592_v4, %v592_v4 }
 0x10d   : > { %v667_v11 = vunpack.c.l.b16 %v619_v7 }
 0x10f   : > { %v544_v5 = vpop.f32.mrf.mxu0  ;;  %v941_v63 = vpop.f32.mrf.mxu3 }
 0x110   : > { %v593_v6 = vpop.f32.mrf.mxu1 }
 0x111   : > { %v594_v8 = vadd.f32 %v593_v6, %v544_v5 }
 0x113   : > { %v620_v10 = vpack.c.bf16 %v594_v8, %v594_v8 }
 0x115   : > { %v668_v12 = vunpack.c.l.b16 %v620_v10 }
 0x117   : > { %v679_v13 = vpack.c.b16 %v668_v12, %v667_v11  ;;  %v547_v14 = vpop.f32.mrf.mxu0  ;;  %v944_v4 = vpop.f32.mrf.mxu3 }
 0x118   : > { %v596_v15 = vpop.f32.mrf.mxu1 }
 0x119   : > { %899 = vmatmul.bf16.gmra.mxu2 %v679_v13  ;;  %v597_v16 = vadd.f32 %v596_v15, %v547_v14 }
 0x11b   : > { %v621_v19 = vpack.c.bf16 %v597_v16, %v597_v16 }
 0x11d   : > { %v669_v23 = vunpack.c.l.b16 %v621_v19 }
 0x11f   : > { %v549_v17 = vpop.f32.mrf.mxu0  ;;  %v946_v9 = vpop.f32.mrf.mxu3 }
 0x120   : > { %v598_v18 = vpop.f32.mrf.mxu1 }
 0x121   : > { %v599_v20 = vadd.f32 %v598_v18, %v549_v17 }
 0x123   : > { %v622_v22 = vpack.c.bf16 %v599_v20, %v599_v20 }
 0x125   : > { %v670_v24 = vunpack.c.l.b16 %v622_v22 }
 0x127   : > { %v680_v25 = vpack.c.b16 %v670_v24, %v669_v23  ;;  %v552_v26 = vpop.f32.mrf.mxu0  ;;  %v949_v14 = vpop.f32.mrf.mxu3 }
 0x128   : > { %v601_v27 = vpop.f32.mrf.mxu1 }
 0x129   : > { %904 = vmatmul.bf16.gmra.mxu2 %v680_v25  ;;  %v602_v28 = vadd.f32 %v601_v27, %v552_v26 }
 0x12b   : > { %v623_v31 = vpack.c.bf16 %v602_v28, %v602_v28 }
 0x12d   : > { %v671_v34 = vunpack.c.l.b16 %v623_v31 }
 0x12f   : > { %v554_v29 = vpop.f32.mrf.mxu0  ;;  %v951_v18 = vpop.f32.mrf.mxu3 }
 0x130   : > { %v603_v30 = vpop.f32.mrf.mxu1 }
 0x131   : > { %v604_v32 = vadd.f32 %v603_v30, %v554_v29 }
 0x133   : > { %v624_v33 = vpack.c.bf16 %v604_v32, %v604_v32 }
 0x135   : > { %v672_v35 = vunpack.c.l.b16 %v624_v33 }
 0x137   : > { %v681_v36 = vpack.c.b16 %v672_v35, %v671_v34  ;;  %v557_v37 = vpop.f32.mrf.mxu0  ;;  %v954_v23 = vpop.f32.mrf.mxu3 }
 0x138   : > { %v606_v38 = vpop.f32.mrf.mxu1 }
 0x139   : > { %909 = vmatmul.bf16.gmra.mxu2 %v681_v36  ;;  %v607_v39 = vadd.f32 %v606_v38, %v557_v37 }
 0x13b   : > { %v625_v43 = vpack.c.bf16 %v607_v39, %v607_v39 }
 0x13d   : > { %v673_v46 = vunpack.c.l.b16 %v625_v43 }
 0x13f   : > { %v559_v41 = vpop.f32.mrf.mxu0  ;;  %v956_v28 = vpop.f32.mrf.mxu3 }
 0x140   : > { %v608_v42 = vpop.f32.mrf.mxu1 }
 0x141   : > { %v609_v44 = vadd.f32 %v608_v42, %v559_v41 }
 0x143   : > { %v626_v45 = vpack.c.bf16 %v609_v44, %v609_v44 }
 0x145   : > { %v674_v47 = vunpack.c.l.b16 %v626_v45 }
 0x147   : > { %v682_v48 = vpack.c.b16 %v674_v47, %v673_v46  ;;  %v959_v33 = vpop.f32.mrf.mxu3 }
 0x149   : > { %914 = vmatmul.bf16.gmra.mxu2 %v682_v48 }
 0x14f   : > { %v961_v37 = vpop.f32.mrf.mxu3 }
 0x157   : > { %v964_v41 = vpop.f32.mrf.mxu3 }
 0x15c   : > { %v880_v52 = vpop.f32.mrf.mxu2 }
 0x15d   : > { %v881_v53 = vadd.f32 %v1755_v51, %v880_v52 }
 0x15f   : > { %v930_v55 = vadd.f32 %v929_v40, %v881_v53  ;;  %v966_v47 = vpop.f32.mrf.mxu3 }
 0x161   : > { %969 = vst [vmem:[%s1762_s27] sm:$0xff] %v930_v55 }
 0x164   : > { %v882_v56 = vpop.f32.mrf.mxu2 }
 0x165   : > { %v883_v57 = vadd.f32 %v1755_v51, %v882_v56 }
 0x167   : > { %v932_v58 = vadd.f32 %v931_v49, %v883_v57 }
 0x169   : > { %970 = vst [vmem:[%s1762_s27 + $0x8] sm:$0xff] %v932_v58 }
 0x16c   : > { %v885_v60 = vpop.f32.mrf.mxu2 }
 0x16d   : > { %v886_v61 = vadd.f32 %v1755_v51, %v885_v60 }
 0x16f   : > { %v935_v62 = vadd.f32 %v934_v50, %v886_v61 }
 0x171   : > { %971 = vst [vmem:[%s1762_s27 + $0x10] sm:$0xff] %v935_v62 }
 0x174   : > { %v887_v0 = vpop.f32.mrf.mxu2 }
 0x175   : > { %v888_v1 = vadd.f32 %v1755_v51, %v887_v0 }
 0x177   : > { %v937_v2 = vadd.f32 %v936_v54, %v888_v1 }
 0x179   : > { %972 = vst [vmem:[%s1762_s27 + $0x18] sm:$0xff] %v937_v2 }
 0x17c   : > { %v890_v3 = vpop.f32.mrf.mxu2 }
 0x17d   : > { %v891_v5 = vadd.f32 %v1755_v51, %v890_v3 }
 0x17f   : > { %v940_v6 = vadd.f32 %v939_v59, %v891_v5 }
 0x181   : > { %973 = vst [vmem:[%s1762_s27 + $0x20] sm:$0xff] %v940_v6 }
 0x184   : > { %v892_v7 = vpop.f32.mrf.mxu2 }
 0x185   : > { %v893_v8 = vadd.f32 %v1755_v51, %v892_v7 }
 0x187   : > { %v942_v10 = vadd.f32 %v941_v63, %v893_v8 }
 0x189   : > { %974 = vst [vmem:[%s1762_s27 + $0x28] sm:$0xff] %v942_v10 }
 0x18c   : > { %v895_v11 = vpop.f32.mrf.mxu2 }
 0x18d   : > { %v896_v12 = vadd.f32 %v1755_v51, %v895_v11 }
 0x18f   : > { %v945_v13 = vadd.f32 %v944_v4, %v896_v12 }
 0x191   : > { %975 = vst [vmem:[%s1762_s27 + $0x30] sm:$0xff] %v945_v13 }
 0x194   : > { %v897_v15 = vpop.f32.mrf.mxu2 }
 0x195   : > { %v898_v16 = vadd.f32 %v1755_v51, %v897_v15 }
 0x197   : > { %v947_v17 = vadd.f32 %v946_v9, %v898_v16 }
 0x199   : > { %976 = vst [vmem:[%s1762_s27 + $0x38] sm:$0xff] %v947_v17 }
 0x19c   : > { %v900_v19 = vpop.f32.mrf.mxu2 }
 0x19d   : > { %v901_v20 = vadd.f32 %v1755_v51, %v900_v19 }
 0x19f   : > { %v950_v21 = vadd.f32 %v949_v14, %v901_v20 }
 0x1a1   : > { %977 = vst [vmem:[%s1762_s27 + $0x40] sm:$0xff] %v950_v21 }
 0x1a4   : > { %v902_v22 = vpop.f32.mrf.mxu2 }
 0x1a5   : > { %v903_v24 = vadd.f32 %v1755_v51, %v902_v22 }
 0x1a7   : > { %v952_v25 = vadd.f32 %v951_v18, %v903_v24 }
 0x1a9   : > { %978 = vst [vmem:[%s1762_s27 + $0x48] sm:$0xff] %v952_v25 }
 0x1ac   : > { %v905_v26 = vpop.f32.mrf.mxu2 }
 0x1ad   : > { %v906_v27 = vadd.f32 %v1755_v51, %v905_v26 }
 0x1af   : > { %v955_v29 = vadd.f32 %v954_v23, %v906_v27 }
 0x1b1   : > { %979 = vst [vmem:[%s1762_s27 + $0x50] sm:$0xff] %v955_v29 }
 0x1b4   : > { %v907_v30 = vpop.f32.mrf.mxu2 }
 0x1b5   : > { %v908_v31 = vadd.f32 %v1755_v51, %v907_v30 }
 0x1b7   : > { %v957_v32 = vadd.f32 %v956_v28, %v908_v31 }
 0x1b9   : > { %980 = vst [vmem:[%s1762_s27 + $0x58] sm:$0xff] %v957_v32 }
 0x1bc   : > { %v910_v34 = vpop.f32.mrf.mxu2 }
 0x1bd   : > { %v911_v35 = vadd.f32 %v1755_v51, %v910_v34 }
 0x1bf   : > { %v960_v36 = vadd.f32 %v959_v33, %v911_v35 }
 0x1c1   : > { %981 = vst [vmem:[%s1762_s27 + $0x60] sm:$0xff] %v960_v36 }
 0x1c4   : > { %v912_v38 = vpop.f32.mrf.mxu2 }
 0x1c5   : > { %v913_v39 = vadd.f32 %v1755_v51, %v912_v38 }
 0x1c7   : > { %v962_v40 = vadd.f32 %v961_v37, %v913_v39 }
 0x1c9   : > { %982 = vst [vmem:[%s1762_s27 + $0x68] sm:$0xff] %v962_v40 }
 0x1cc   : > { %v915_v42 = vpop.f32.mrf.mxu2 }
 0x1cd   : > { %v916_v43 = vadd.f32 %v1755_v51, %v915_v42 }
 0x1cf   : > { %v965_v44 = vadd.f32 %v964_v41, %v916_v43 }
 0x1d1   : > { %983 = vst [vmem:[%s1762_s27 + $0x70] sm:$0xff] %v965_v44 }
 0x1d4   : > { %v917_v45 = vpop.f32.mrf.mxu2 }
 0x1d5   : > { %v918_v46 = vadd.f32 %v1755_v51, %v917_v45 }
 0x1d7   : > { %v967_v48 = vadd.f32 %v966_v47, %v918_v46 }
 0x1d9   : > { %984 = vst [vmem:[%s1762_s27 + $0x78] sm:$0xff] %v967_v48 }
 0x1da PF: > { %p16_p4 = scmp.ge.s32.totalorder %s1610_s6, 4   ;;  %s1818_s18 = smov %s1519_s19 }
 0x1db   : > { %s1819_s19 = smov %s1523_s20  ;;  %s1820_s20 = smov %s1620_s11 }
 0x1dc   : > { %s1821_s21 = smov %s1610_s6  ;;  %18 = sbr.rel (!%p16_p4) target bundleno = 4 (0x4), region = 87 }
 0x1e1   :  { %1007 = vsyncpa [#allocation3], 1 }
 0x1e2   :  { %1009 = vsyncpa [#allocation3 + $0x1], 1 }
 0x1e3   :  { %1010 = vsyncpa [#allocation5], 1 }

// kernel: sage_forward.4
= control target key start
LH: loop header
LB: loop body
LE: loop exit
PB: predicated region body
PF: predicated region fallthrough
CT: control target
= control target key end

     0   :  { %10 = vsyncpa [#allocation3], 0  ;;  %s1882_s0 = inlined_call_operand.hbm [shape: bf16[256,256], index: 0, kind: input, shape index: {}]   ;;  %s1883_s1 = inlined_call_operand.vmem [shape: bf16[256,128], index: 1, kind: input, shape index: {}, may-alias: {1,2}]   ;;  %s1884_s2 = inlined_call_operand.vmem [shape: bf16[256,128], index: 2, kind: input, shape index: {}, may-alias: {1,2}]   ;;  %s1885_s3 = inlined_call_operand.hbm [shape: bf16[256,128], index: 3, kind: input, shape index: {}]   ;;  %s1886_s4 = inlined_call_operand.vmem [shape: f32[1,128], index: 4, kind: input, shape index: {}]   ;;  %s1887_s5 = inlined_call_operand.vmem [shape: bf16[256,128], index: 5, kind: output, shape index: {}]  }
   0x1   :  { %12 = vsyncpa [#allocation3 + $0x1], 0 }
   0x2   :  { %13 = vsyncpa [#allocation5], 0  ;;  %s1643_s18 = smov 0   ;;  %s1645_s19 = smov 0  }
   0x3   :  { %s1647_s20 = smov 0   ;;  %s1649_s21 = smov 0  }
   0x4 LB: > { %s1106_s22 = sadd.s32 4294967295, %s1606_s21   ;;  %p39_p0 = scmp.ne.s32.totalorder %s1598_s19, %s1594_s18  ;;  %s1606_s21 = sphi %s1649_s21, %s1895_s21   ;;  %s1602_s20 = sphi %s1647_s20, %s1894_s20   ;;  %s1598_s19 = sphi %s1645_s19, %s1893_s19   ;;  %s1594_s18 = sphi %s1643_s18, %s1892_s18  }
   0x5   : > { %p1665_p1 = scmp.eq.s32.totalorder %s1106_s22, 0  ;;  %p1108_p2 = scmp.ge.s32.totalorder %s1606_s21, 1 }
   0x6   : > { %p165_p3 = scmp.lt.s32.totalorder %s1606_s21, 3  ;;  %s179_s27 = sshll.u32 %s1885_s3, 4  ;;  %s180_s27 = int_to_ptr.hbm [resolvable:$true] %s179_s27 }
   0x7   : > { %p1673_p4 = por %p1665_p1, %p39_p0  ;;  %s1608_s29 = smov [#allocation4]  }
   0x8   : > { %p1680_p5 = pnand %p1108_p2, %p165_p3  ;;  %s181_s30 = sshll.u32 %s1608_s29, 4  ;;  %s182_s30 = int_to_ptr.vmem [resolvable:$true] %s181_s30 }
   0x9   : > { %s1689_s6 = sadd.s32 1, %s1606_s21   ;;  %s1609_s7 = smov 64  }
   0xa   : > { %p1459_p6 = pneg %p1680_p5  ;;  %s1610_s8 = smov 4  }
   0xb   : > { %s23_s9 = ssub.s32 %s1606_s21, %s1689_s6  ;;  %s26_s10 = sadd.s32 1, %s1602_s20 }
   0xc   : > { %p1460_p7 = pnand %p1459_p6, %p1665_p1  ;;  %p24_p8 = scmp.eq.s32.totalorder %s23_s9, 0 }
   0xd   : > { %p33_p9 = scmp.ne.s32.totalorder %s1602_s20, %s1598_s19  ;;  %p34_p10 = scmp.eq.s32.totalorder %s1606_s21, 0 }
   0xe   : > { %1462 = dma.hbm_to_vmem [thread:$0]  (!%p1460_p7), %s180_s27, 2048, %s182_s30, [#allocation5], %s1609_s7, %s1609_s7, %s1610_s8  }
   0xf   : > { %p1468_p11 = scmp.lt.s32.totalorder %s1606_s21, 2  ;;  %p35_p12 = por %p34_p10, %p33_p9 }
  0x10   : > { %s1699_s11 = scalar_select %p24_p8, %s1602_s20, %s26_s10  }
  0x11   : > { %s198_s12 = sand.u32 1, %s1602_s20   ;;  %s1349_s14 = sshll.u32 %s1606_s21, 7 }
  0x12   : > { %s1111_s13 = sshll.u32 %s198_s12, 7  ;;  %s208_s17 = scalar_lea.hbm %s1882_s0, %s1349_s14 }
  0x13   : > { %s202_s18 = scalar_lea.vmem [#allocation2], %s1111_s13  ;;  %s209_s26 = sshll.u32 %s208_s17, 4  ;;  %s210_s26 = int_to_ptr.hbm [resolvable:$true] %s209_s26 }
  0x14   : > { %s211_s25 = sshll.u32 %s202_s18, 4  ;;  %p1706_p13 = pnand %p1468_p11, %p35_p12  ;;  %s212_s25 = int_to_ptr.vmem [resolvable:$true] %s211_s25 }
  0x15   : > { %s199_s29 = scalar_lea.sflag [#allocation3], %s198_s12  ;;  %s1538_s30 = sshra.s32 %s210_s26, 4  ;;  %s1539_s30 = int_to_ptr.hbm [resolvable:$true] %s1538_s30 }
  0x16   : > { %s1540_s7 = scalar_lea.hbm %s1539_s30, 128  ;;  %p1542_p2 = pneg %p1706_p13 }
  0x17   : > { %p1541_p0 = scmp.ne.s32.totalorder %s1539_s30, %s1540_s7  ;;  %s1545_s10 = scalar_lea.hbm %s1882_s0, 256 }
  0x18   : > { %p1546_p7 = scmp.lt.s32.totalorder %s1539_s30, %s1882_s0  ;;  %p1547_p8 = scmp.lt.s32.totalorder %s1545_s10, %s1540_s7 }
  0x19   : > { %p1543_p3 = pnand %p1542_p2, %p1541_p0 }
  0x1a   : > { %p1548_p9 = por %p1547_p8, %p1546_p7 }
  0x1b   : > { %p1544_p6 = pneg %p1543_p3 }
  0x1d   : > { %p1549_p10 = pnand %p1548_p9, %p1544_p6 }
  0x1f   : > { %1552 = shalt.err (!%p1549_p10)
}
  0x20   : > { %s1611_s12 = smov 128   ;;  %s1612_s15 = smov 8  }
  0x21   : > { %1466 = dma.hbm_to_vmem [thread:$0]  (!%p1706_p13), %s210_s26, 2048, %s212_s25, %s199_s29, %s1611_s12, %s1611_s12, %s1612_s15  }
  0x22   : > { %232 = sbr.rel (%p1680_p5) target bundleno = 478 (0x1de), region = 40  ;;  %s234_s16 = sand.u32 (!%p1680_p5), 1, %s1598_s19  }
  0x23   : > { %s1116_s17 = sshll.u32 (!%p1680_p5), %s234_s16, 7  ;;  %s235_s18 = scalar_lea.sflag (!%p1680_p5), [#allocation3], %s234_s16 }
  0x24   : > { %s1723_s8 = scalar_lea.vmem (!%p1680_p5), [#allocation2], %s1116_s17 }
  0x27   : > { %1585 = dma.done.wait (%p1673_p4), %s235_s18, 2048  }
  0x28   : > { %1587 = vsyncadd (%p1673_p4), %s235_s18, 4294965248 }
  0x29   : > { %1589 = dma.done.wait (%p1665_p1), [#allocation5], 2048  }
  0x2a   : > { %1591 = vsyncadd (%p1665_p1), [#allocation5], 4294965248  ;;  %v1373_v0 = vld [vmem:[%s1883_s1 + $0x38] sm:$0xff]  ;;  %v1372_v2 = vld [vmem:[%s1883_s1 + $0x30] sm:$0xff]  ;;  %s1118_s15 = sshll.u32 %s1106_s22, 4 }
  0x2b   : > { %v1381_v1 = vld [vmem:[%s1883_s1 + $0x78] sm:$0xff]  ;;  %513 = vmatpush.bf16.msra.mxu0 %v1373_v0  ;;  %v1380_v3 = vld [vmem:[%s1883_s1 + $0x70] sm:$0xff]  ;;  %v1371_v4 = vld [vmem:[%s1883_s1 + $0x28] sm:$0xff]  ;;  %p278_p1 = scmp.lt.s32.totalorder %s1118_s15, 31 }
  0x2c   : > { %562 = vmatpush.bf16.msra.mxu1 %v1381_v1  ;;  %v1379_v5 = vld [vmem:[%s1883_s1 + $0x68] sm:$0xff]  ;;  %v1370_v6 = vld [vmem:[%s1883_s1 + $0x20] sm:$0xff]  ;;  %v1369_v8 = vld [vmem:[%s1883_s1 + $0x18] sm:$0xff] }
  0x2d   : > { %v1378_v7 = vld [vmem:[%s1883_s1 + $0x60] sm:$0xff]  ;;  %v1377_v9 = vld [vmem:[%s1883_s1 + $0x58] sm:$0xff]  ;;  %v1368_v10 = vld [vmem:[%s1883_s1 + $0x10] sm:$0xff]  ;;  %s1897_s15 = smov (!%p278_p1, %s1118_s15), 31 }
  0x2e   : > { %v1376_v11 = vld [vmem:[%s1883_s1 + $0x50] sm:$0xff]  ;;  %v1367_v12 = vld [vmem:[%s1883_s1 + $0x8] sm:$0xff]  ;;  %v1366_v14 = vld [vmem:[%s1883_s1] sm:$0xff]  ;;  %s1119_s21 = sshll.u32 %s1897_s15, 2 }
  0x2f   : > { %514 = vmatpush.bf16.msra.mxu0 %v1372_v2  ;;  %v1375_v13 = vld [vmem:[%s1883_s1 + $0x48] sm:$0xff]  ;;  %v1374_v15 = vld [vmem:[%s1883_s1 + $0x40] sm:$0xff]  ;;  %v1132_v22 = vld [vmem:[%s1723_s8 + $0x10] sm:$0xf]  ;;  %s1819_s17 = scalar_lea.vmem %s1884_s2, %s1119_s21  ;;  %s1845_s26 = scalar_lea.vmem %s1887_s5, %s1119_s21 }
  0x30   : > { %563 = vmatpush.bf16.msra.mxu1 %v1380_v3  ;;  %v1124_v16 = vld [vmem:[%s1723_s8] sm:$0xf]  ;;  %v1351_v17 = vld [vmem:[%s1723_s8 + $0x4] sm:$0xf0]  ;;  %v1350_v18 = vld [vmem:[%s1723_s8 + $0x4] sm:$0xf] }
  0x31   : > { %v1126_v19 = vld [vmem:[%s1723_s8 + $0x8] sm:$0xf0]  ;;  %v1125_v20 = vor.u32 %v1351_v17, %v1124_v16  ;;  %v1353_v23 = vld [vmem:[%s1723_s8 + $0x14] sm:$0xf0]  ;;  %v1352_v24 = vld [vmem:[%s1723_s8 + $0x14] sm:$0xf] }
  0x32   : > { %v1129_v21 = vor.u32 %v1350_v18, %v1126_v19  ;;  %v1134_v25 = vld [vmem:[%s1723_s8 + $0x18] sm:$0xf0]  ;;  %v1133_v26 = vor.u32 %v1353_v23, %v1132_v22  ;;  %v1140_v28 = vld [vmem:[%s1723_s8 + $0x20] sm:$0xf]  ;;  %v1355_v29 = vld [vmem:[%s1723_s8 + $0x24] sm:$0xf0] }
  0x33   : > { %515 = vmatpush.bf16.msra.mxu0 %v1371_v4  ;;  %v1137_v27 = vor.u32 %v1352_v24, %v1134_v25  ;;  %v1354_v30 = vld [vmem:[%s1723_s8 + $0x24] sm:$0xf]  ;;  %v1142_v31 = vld [vmem:[%s1723_s8 + $0x28] sm:$0xf0]  ;;  %v1141_v32 = vor.u32 %v1355_v29, %v1140_v28  ;;  %v1148_v34 = vld [vmem:[%s1723_s8 + $0x30] sm:$0xf] }
  0x34   : > { %564 = vmatpush.bf16.msra.mxu1 %v1379_v5  ;;  %v1145_v33 = vor.u32 %v1354_v30, %v1142_v31  ;;  %v1357_v35 = vld [vmem:[%s1723_s8 + $0x34] sm:$0xf0]  ;;  %v1356_v36 = vld [vmem:[%s1723_s8 + $0x34] sm:$0xf]  ;;  %v1150_v37 = vld [vmem:[%s1723_s8 + $0x38] sm:$0xf0] }
  0x35   : > { %v1149_v38 = vor.u32 %v1357_v35, %v1148_v34  ;;  %v1153_v39 = vor.u32 %v1356_v36, %v1150_v37  ;;  %v1156_v40 = vld [vmem:[%s1723_s8 + $0x40] sm:$0xf]  ;;  %v1359_v41 = vld [vmem:[%s1723_s8 + $0x44] sm:$0xf0]  ;;  %v1358_v42 = vld [vmem:[%s1723_s8 + $0x44] sm:$0xf] }
  0x36   : > { %v1158_v43 = vld [vmem:[%s1723_s8 + $0x48] sm:$0xf0]  ;;  %v1157_v44 = vor.u32 %v1359_v41, %v1156_v40  ;;  %v1405_v46 = vld [vmem:[#allocation4 + $0x78] sm:$0xff]  ;;  %v1404_v48 = vld [vmem:[#allocation4 + $0x70] sm:$0xff] }
  0x37   : > { %516 = vmatpush.bf16.msra.mxu0 %v1370_v6  ;;  %v1161_v45 = vor.u32 %v1358_v42, %v1158_v43  ;;  %v1397_v47 = vld [vmem:[#allocation4 + $0x38] sm:$0xff]  ;;  %920 = vmatpush.bf16.msra.mxu3 %v1405_v46  ;;  %v1164_v49 = vld [vmem:[%s1723_s8 + $0x50] sm:$0xf]  ;;  %v1360_v51 = vld [vmem:[%s1723_s8 + $0x54] sm:$0xf] }
  0x38   : > { %565 = vmatpush.bf16.msra.mxu1 %v1378_v7  ;;  %871 = vmatpush.bf16.msra.mxu2 %v1397_v47  ;;  %v1361_v50 = vld [vmem:[%s1723_s8 + $0x54] sm:$0xf0]  ;;  %v1166_v52 = vld [vmem:[%s1723_s8 + $0x58] sm:$0xf0]  ;;  %v1403_v55 = vld [vmem:[#allocation4 + $0x68] sm:$0xff] }
  0x39   : > { %v1165_v53 = vor.u32 %v1361_v50, %v1164_v49  ;;  %v1169_v54 = vor.u32 %v1360_v51, %v1166_v52  ;;  %v1396_v56 = vld [vmem:[#allocation4 + $0x30] sm:$0xff]  ;;  %v1402_v57 = vld [vmem:[#allocation4 + $0x60] sm:$0xff]  ;;  %v1395_v58 = vld [vmem:[#allocation4 + $0x28] sm:$0xff] }
  0x3a   : > { %v1401_v59 = vld [vmem:[#allocation4 + $0x58] sm:$0xff]  ;;  %v1394_v60 = vld [vmem:[#allocation4 + $0x20] sm:$0xff]  ;;  %v1363_v62 = vld [vmem:[%s1723_s8 + $0x64] sm:$0xf0] }
  0x3b   : > { %517 = vmatpush.bf16.msra.mxu0 %v1369_v8  ;;  %921 = vmatpush.bf16.msra.mxu3 %v1404_v48  ;;  %v1172_v61 = vld [vmem:[%s1723_s8 + $0x60] sm:$0xf]  ;;  %v1362_v63 = vld [vmem:[%s1723_s8 + $0x64] sm:$0xf]  ;;  %v1174_v0 = vld [vmem:[%s1723_s8 + $0x68] sm:$0xf0] }
  0x3c   : > { %566 = vmatpush.bf16.msra.mxu1 %v1377_v9  ;;  %872 = vmatpush.bf16.msra.mxu2 %v1396_v56  ;;  %v1400_v1 = vld [vmem:[#allocation4 + $0x50] sm:$0xff]  ;;  %v1173_v2 = vor.u32 %v1363_v62, %v1172_v61  ;;  %v1177_v3 = vor.u32 %v1362_v63, %v1174_v0  ;;  %v1393_v4 = vld [vmem:[#allocation4 + $0x18] sm:$0xff]  ;;  %v1399_v5 = vld [vmem:[#allocation4 + $0x48] sm:$0xff] }
  0x3d   : > { %v1392_v6 = vld [vmem:[#allocation4 + $0x10] sm:$0xff]  ;;  %v1398_v7 = vld [vmem:[#allocation4 + $0x40] sm:$0xff]  ;;  %v1391_v8 = vld [vmem:[#allocation4 + $0x8] sm:$0xff] }
  0x3e   : > { %v1382_v9 = vld [vmem:[%s1819_s17] sm:$0xff]  ;;  %v1383_v17 = vld [vmem:[%s1819_s17 + $0x8] sm:$0xff]  ;;  %v1384_v25 = vld [vmem:[%s1819_s17 + $0x10] sm:$0xff] }
  0x3f   : > { %518 = vmatpush.bf16.msra.mxu0 %v1368_v10  ;;  %922 = vmatpush.bf16.msra.mxu3 %v1403_v55  ;;  %v1180_v10 = vld [vmem:[%s1723_s8 + $0x70] sm:$0xf]  ;;  %v1385_v37 = vld [vmem:[%s1819_s17 + $0x18] sm:$0xff]  ;;  %v1386_v49 = vld [vmem:[%s1819_s17 + $0x20] sm:$0xff] }
  0x40   : > { %567 = vmatpush.bf16.msra.mxu1 %v1376_v11  ;;  %873 = vmatpush.bf16.msra.mxu2 %v1395_v58  ;;  %v1365_v11 = vld [vmem:[%s1723_s8 + $0x74] sm:$0xf0]  ;;  %v1387_v61 = vld [vmem:[%s1819_s17 + $0x28] sm:$0xff] }
  0x43   : > { %519 = vmatpush.bf16.msra.mxu0 %v1367_v12  ;;  %923 = vmatpush.bf16.msra.mxu3 %v1402_v57  ;;  %v1364_v12 = vld [vmem:[%s1723_s8 + $0x74] sm:$0xf] }
  0x44   : > { %568 = vmatpush.bf16.msra.mxu1 %v1375_v13  ;;  %874 = vmatpush.bf16.msra.mxu2 %v1394_v60  ;;  %v1182_v13 = vld [vmem:[%s1723_s8 + $0x78] sm:$0xf0] }
  0x45   : > { %v1185_v16 = vor.u32 %v1364_v12, %v1182_v13 }
  0x47   : > { %520 = vmatpush.bf16.msra.mxu0 %v1366_v14  ;;  %924 = vmatpush.bf16.msra.mxu3 %v1401_v59  ;;  %v1390_v14 = vld [vmem:[#allocation4] sm:$0xff] }
  0x48   : > { %569 = vmatpush.bf16.msra.mxu1 %v1374_v15  ;;  %875 = vmatpush.bf16.msra.mxu2 %v1393_v4  ;;  %v1181_v15 = vor.u32 %v1365_v11, %v1180_v10 }
  0x4a   : > { %521 = vmatmul.bf16.vlgmr.msra.gmra.mxu0 %v1125_v20 }
  0x4b   : > { %570 = vmatmul.bf16.vlgmr.msra.gmra.mxu1 %v1129_v21  ;;  %925 = vmatpush.bf16.msra.mxu3 %v1400_v1 }
  0x4c   : > { %876 = vmatpush.bf16.msra.mxu2 %v1392_v6 }
  0x4f   : > { %926 = vmatpush.bf16.msra.mxu3 %v1399_v5 }
  0x50   : > { %877 = vmatpush.bf16.msra.mxu2 %v1391_v8 }
  0x53   : > { %927 = vmatpush.bf16.msra.mxu3 %v1398_v7 }
  0x54   : > { %878 = vmatpush.bf16.msra.mxu2 %v1390_v14 }
  0x56   : > { %928 = vmatmul.bf16.vlgmr.msra.gmra.mxu3 %v1382_v9  ;;  %v1388_v9 = vld [vmem:[%s1819_s17 + $0x30] sm:$0xff] }
  0x5a   : > { %526 = vmatmul.bf16.gmra.mxu0 %v1133_v26 }
  0x5b   : > { %575 = vmatmul.bf16.gmra.mxu1 %v1137_v27 }
  0x66   : > { %933 = vmatmul.bf16.gmra.mxu3 %v1383_v17 }
  0x6a   : > { %531 = vmatmul.bf16.gmra.mxu0 %v1141_v32 }
  0x6b   : > { %580 = vmatmul.bf16.gmra.mxu1 %v1145_v33 }
  0x76   : > { %938 = vmatmul.bf16.gmra.mxu3 %v1384_v25 }
  0x7a   : > { %536 = vmatmul.bf16.gmra.mxu0 %v1149_v38 }
  0x7b   : > { %585 = vmatmul.bf16.gmra.mxu1 %v1153_v39 }
  0x86   : > { %943 = vmatmul.bf16.gmra.mxu3 %v1385_v37 }
  0x8a   : > { %541 = vmatmul.bf16.gmra.mxu0 %v1157_v44 }
  0x8b   : > { %590 = vmatmul.bf16.gmra.mxu1 %v1161_v45 }
  0x96   : > { %948 = vmatmul.bf16.gmra.mxu3 %v1386_v49 }
  0x9a   : > { %546 = vmatmul.bf16.gmra.mxu0 %v1165_v53 }
  0x9b   : > { %595 = vmatmul.bf16.gmra.mxu1 %v1169_v54 }
  0xa6   : > { %953 = vmatmul.bf16.gmra.mxu3 %v1387_v61 }
  0xaa   : > { %551 = vmatmul.bf16.gmra.mxu0 %v1173_v2 }
  0xab   : > { %600 = vmatmul.bf16.gmra.mxu1 %v1177_v3 }
  0xb6   : > { %958 = vmatmul.bf16.gmra.mxu3 %v1388_v9 }
  0xba   : > { %556 = vmatmul.bf16.gmra.mxu0 %v1181_v15 }
  0xbb   : > { %605 = vmatmul.bf16.gmra.mxu1 %v1185_v16 }
  0xc7   : > { %v522_v18 = vpop.f32.mrf.mxu0 }
  0xc8   : > { %v571_v19 = vpop.f32.mrf.mxu1 }
  0xc9   : > { %v572_v20 = vadd.f32 %v571_v19, %v522_v18 }
  0xcb   : > { %v611_v23 = vpack.c.bf16 %v572_v20, %v572_v20 }
  0xcd   : > { %v659_v27 = vunpack.c.l.b16 %v611_v23 }
  0xcf   : > { %v524_v21 = vpop.f32.mrf.mxu0 }
  0xd0   : > { %v573_v22 = vpop.f32.mrf.mxu1 }
  0xd1   : > { %v574_v24 = vadd.f32 %v573_v22, %v524_v21  ;;  %v1389_v21 = vld [vmem:[%s1819_s17 + $0x38] sm:$0xff] }
  0xd2   : > { %963 = vmatmul.bf16.gmra.mxu3 %v1389_v21 }
  0xd3   : > { %v612_v26 = vpack.c.bf16 %v574_v24, %v574_v24 }
  0xd5   : > { %v660_v28 = vunpack.c.l.b16 %v612_v26 }
  0xd7   : > { %v675_v29 = vpack.c.b16 %v660_v28, %v659_v27  ;;  %v527_v30 = vpop.f32.mrf.mxu0 }
  0xd8   : > { %v576_v31 = vpop.f32.mrf.mxu1 }
  0xd9   : > { %879 = vmatmul.bf16.vlgmr.msra.gmra.mxu2 %v675_v29  ;;  %v577_v32 = vadd.f32 %v576_v31, %v527_v30 }
  0xdb   : > { %v613_v35 = vpack.c.bf16 %v577_v32, %v577_v32 }
  0xdd   : > { %v661_v39 = vunpack.c.l.b16 %v613_v35 }
  0xdf   : > { %v529_v33 = vpop.f32.mrf.mxu0 }
  0xe0   : > { %v578_v34 = vpop.f32.mrf.mxu1 }
  0xe1   : > { %v579_v36 = vadd.f32 %v578_v34, %v529_v33 }
  0xe3   : > { %v614_v38 = vpack.c.bf16 %v579_v36, %v579_v36 }
  0xe5   : > { %v662_v40 = vunpack.c.l.b16 %v614_v38 }
  0xe7   : > { %v676_v41 = vpack.c.b16 %v662_v40, %v661_v39  ;;  %v532_v42 = vpop.f32.mrf.mxu0  ;;  %v929_v40 = vpop.f32.mrf.mxu3 }
  0xe8   : > { %v581_v43 = vpop.f32.mrf.mxu1 }
  0xe9   : > { %884 = vmatmul.bf16.gmra.mxu2 %v676_v41  ;;  %v582_v44 = vadd.f32 %v581_v43, %v532_v42 }
  0xeb   : > { %v615_v47 = vpack.c.bf16 %v582_v44, %v582_v44 }
  0xed   : > { %v663_v51 = vunpack.c.l.b16 %v615_v47 }
  0xef   : > { %v534_v45 = vpop.f32.mrf.mxu0  ;;  %v931_v49 = vpop.f32.mrf.mxu3 }
  0xf0   : > { %v583_v46 = vpop.f32.mrf.mxu1 }
  0xf1   : > { %v584_v48 = vadd.f32 %v583_v46, %v534_v45 }
  0xf3   : > { %v616_v50 = vpack.c.bf16 %v584_v48, %v584_v48 }
  0xf5   : > { %v664_v52 = vunpack.c.l.b16 %v616_v50 }
  0xf7   : > { %v677_v53 = vpack.c.b16 %v664_v52, %v663_v51  ;;  %v537_v54 = vpop.f32.mrf.mxu0  ;;  %v934_v50 = vpop.f32.mrf.mxu3  ;;  %v1836_v52 = vld [vmem:[%s1886_s4] ss:$0 sm:$0xff] }
  0xf8   : > { %v586_v55 = vpop.f32.mrf.mxu1 }
  0xf9   : > { %889 = vmatmul.bf16.gmra.mxu2 %v677_v53  ;;  %v587_v56 = vadd.f32 %v586_v55, %v537_v54 }
  0xfb   : > { %v617_v59 = vpack.c.bf16 %v587_v56, %v587_v56 }
  0xfd   : > { %v665_v63 = vunpack.c.l.b16 %v617_v59 }
  0xff   : > { %v539_v57 = vpop.f32.mrf.mxu0  ;;  %v936_v53 = vpop.f32.mrf.mxu3 }
 0x100   : > { %v588_v58 = vpop.f32.mrf.mxu1 }
 0x101   : > { %v589_v60 = vadd.f32 %v588_v58, %v539_v57 }
 0x103   : > { %v618_v62 = vpack.c.bf16 %v589_v60, %v589_v60 }
 0x105   : > { %v666_v0 = vunpack.c.l.b16 %v618_v62 }
 0x107   : > { %v678_v1 = vpack.c.b16 %v666_v0, %v665_v63  ;;  %v542_v2 = vpop.f32.mrf.mxu0  ;;  %v939_v59 = vpop.f32.mrf.mxu3 }
 0x108   : > { %v591_v3 = vpop.f32.mrf.mxu1 }
 0x109   : > { %894 = vmatmul.bf16.gmra.mxu2 %v678_v1  ;;  %v592_v4 = vadd.f32 %v591_v3, %v542_v2 }
 0x10b   : > { %v619_v7 = vpack.c.bf16 %v592_v4, %v592_v4 }
 0x10d   : > { %v667_v11 = vunpack.c.l.b16 %v619_v7 }
 0x10f   : > { %v544_v5 = vpop.f32.mrf.mxu0  ;;  %v941_v1 = vpop.f32.mrf.mxu3 }
 0x110   : > { %v593_v6 = vpop.f32.mrf.mxu1 }
 0x111   : > { %v594_v8 = vadd.f32 %v593_v6, %v544_v5 }
 0x113   : > { %v620_v10 = vpack.c.bf16 %v594_v8, %v594_v8 }
 0x115   : > { %v668_v12 = vunpack.c.l.b16 %v620_v10 }
 0x117   : > { %v679_v13 = vpack.c.b16 %v668_v12, %v667_v11  ;;  %v547_v14 = vpop.f32.mrf.mxu0  ;;  %v944_v10 = vpop.f32.mrf.mxu3 }
 0x118   : > { %v596_v15 = vpop.f32.mrf.mxu1 }
 0x119   : > { %899 = vmatmul.bf16.gmra.mxu2 %v679_v13  ;;  %v597_v16 = vadd.f32 %v596_v15, %v547_v14 }
 0x11b   : > { %v621_v19 = vpack.c.bf16 %v597_v16, %v597_v16 }
 0x11d   : > { %v669_v23 = vunpack.c.l.b16 %v621_v19 }
 0x11f   : > { %v549_v17 = vpop.f32.mrf.mxu0  ;;  %v946_v15 = vpop.f32.mrf.mxu3 }
 0x120   : > { %v598_v18 = vpop.f32.mrf.mxu1 }
 0x121   : > { %v599_v20 = vadd.f32 %v598_v18, %v549_v17 }
 0x123   : > { %v622_v22 = vpack.c.bf16 %v599_v20, %v599_v20 }
 0x125   : > { %v670_v24 = vunpack.c.l.b16 %v622_v22 }
 0x127   : > { %v680_v25 = vpack.c.b16 %v670_v24, %v669_v23  ;;  %v552_v26 = vpop.f32.mrf.mxu0  ;;  %v949_v21 = vpop.f32.mrf.mxu3 }
 0x128   : > { %v601_v27 = vpop.f32.mrf.mxu1 }
 0x129   : > { %904 = vmatmul.bf16.gmra.mxu2 %v680_v25  ;;  %v602_v28 = vadd.f32 %v601_v27, %v552_v26 }
 0x12b   : > { %v623_v31 = vpack.c.bf16 %v602_v28, %v602_v28 }
 0x12d   : > { %v671_v34 = vunpack.c.l.b16 %v623_v31 }
 0x12f   : > { %v554_v29 = vpop.f32.mrf.mxu0 }
 0x130   : > { %v603_v30 = vpop.f32.mrf.mxu1 }
 0x131   : > { %v604_v32 = vadd.f32 %v603_v30, %v554_v29  ;;  %v951_v29 = vpop.f32.mrf.mxu3 }
 0x133   : > { %v624_v33 = vpack.c.bf16 %v604_v32, %v604_v32 }
 0x135   : > { %v672_v35 = vunpack.c.l.b16 %v624_v33 }
 0x137   : > { %v681_v36 = vpack.c.b16 %v672_v35, %v671_v34  ;;  %v557_v37 = vpop.f32.mrf.mxu0 }
 0x138   : > { %v606_v38 = vpop.f32.mrf.mxu1 }
 0x139   : > { %909 = vmatmul.bf16.gmra.mxu2 %v681_v36  ;;  %v607_v39 = vadd.f32 %v606_v38, %v557_v37  ;;  %v954_v34 = vpop.f32.mrf.mxu3 }
 0x13b   : > { %v625_v43 = vpack.c.bf16 %v607_v39, %v607_v39 }
 0x13d   : > { %v673_v46 = vunpack.c.l.b16 %v625_v43 }
 0x13f   : > { %v559_v41 = vpop.f32.mrf.mxu0 }
 0x140   : > { %v608_v42 = vpop.f32.mrf.mxu1 }
 0x141   : > { %v609_v44 = vadd.f32 %v608_v42, %v559_v41  ;;  %v956_v42 = vpop.f32.mrf.mxu3 }
 0x143   : > { %v626_v45 = vpack.c.bf16 %v609_v44, %v609_v44 }
 0x145   : > { %v674_v47 = vunpack.c.l.b16 %v626_v45 }
 0x147   : > { %v682_v48 = vpack.c.b16 %v674_v47, %v673_v46 }
 0x149   : > { %914 = vmatmul.bf16.gmra.mxu2 %v682_v48  ;;  %v959_v48 = vpop.f32.mrf.mxu3 }
 0x15c   : > { %v880_v51 = vpop.f32.mrf.mxu2 }
 0x15d   : > { %v881_v54 = vadd.f32 %v1836_v52, %v880_v51 }
 0x15f   : > { %v930_v56 = vadd.f32 %v929_v40, %v881_v54 }
 0x161   : > { %v969_v60 = vmax.f32 %v930_v56, 0.0 }
 0x164   : > { %v882_v55 = vpop.f32.mrf.mxu2 }
 0x165   : > { %v883_v57 = vadd.f32 %v1836_v52, %v882_v55  ;;  %v961_v55 = vpop.f32.mrf.mxu3 }
 0x167   : > { %v932_v58 = vadd.f32 %v931_v49, %v883_v57 }
 0x169   : > { %v970_v61 = vmax.f32 %v932_v58, 0.0 }
 0x16b   : > { %v1409_v62 = vpack.c.bf16 %v970_v61, %v969_v60 }
 0x16c   : > { %v885_v63 = vpop.f32.mrf.mxu2 }
 0x16d   : > { %1410 = vst [vmem:[%s1845_s26] sm:$0xff] %v1409_v62   ;;  %v886_v0 = vadd.f32 %v1836_v52, %v885_v63  ;;  %v964_v63 = vpop.f32.mrf.mxu3 }
 0x16f   : > { %v935_v3 = vadd.f32 %v934_v50, %v886_v0 }
 0x171   : > { %v971_v6 = vmax.f32 %v935_v3, 0.0 }
 0x174   : > { %v887_v2 = vpop.f32.mrf.mxu2 }
 0x175   : > { %v888_v4 = vadd.f32 %v1836_v52, %v887_v2 }
 0x177   : > { %v937_v5 = vadd.f32 %v936_v53, %v888_v4 }
 0x179   : > { %v972_v7 = vmax.f32 %v937_v5, 0.0  ;;  %v966_v5 = vpop.f32.mrf.mxu3 }
 0x17b   : > { %v1414_v8 = vpack.c.bf16 %v972_v7, %v971_v6 }
 0x17c   : > { %v890_v9 = vpop.f32.mrf.mxu2 }
 0x17d   : > { %1446 = vst [vmem:[%s1845_s26 + $0x8] sm:$0xff] %v1414_v8   ;;  %v891_v11 = vadd.f32 %v1836_v52, %v890_v9 }
 0x17f   : > { %v940_v13 = vadd.f32 %v939_v59, %v891_v11 }
 0x181   : > { %v973_v17 = vmax.f32 %v940_v13, 0.0 }
 0x184   : > { %v892_v12 = vpop.f32.mrf.mxu2 }
 0x185   : > { %v893_v14 = vadd.f32 %v1836_v52, %v892_v12 }
 0x187   : > { %v942_v16 = vadd.f32 %v941_v1, %v893_v14 }
 0x189   : > { %v974_v18 = vmax.f32 %v942_v16, 0.0 }
 0x18b   : > { %v1419_v19 = vpack.c.bf16 %v974_v18, %v973_v17 }
 0x18c   : > { %v895_v20 = vpop.f32.mrf.mxu2 }
 0x18d   : > { %1447 = vst [vmem:[%s1845_s26 + $0x10] sm:$0xff] %v1419_v19   ;;  %v896_v22 = vadd.f32 %v1836_v52, %v895_v20 }
 0x18f   : > { %v945_v24 = vadd.f32 %v944_v10, %v896_v22 }
 0x191   : > { %v975_v27 = vmax.f32 %v945_v24, 0.0 }
 0x194   : > { %v897_v23 = vpop.f32.mrf.mxu2 }
 0x195   : > { %v898_v25 = vadd.f32 %v1836_v52, %v897_v23 }
 0x197   : > { %v947_v26 = vadd.f32 %v946_v15, %v898_v25 }
 0x199   : > { %v976_v28 = vmax.f32 %v947_v26, 0.0 }
 0x19b   : > { %v1424_v30 = vpack.c.bf16 %v976_v28, %v975_v27 }
 0x19c   : > { %v900_v31 = vpop.f32.mrf.mxu2 }
 0x19d   : > { %1448 = vst [vmem:[%s1845_s26 + $0x18] sm:$0xff] %v1424_v30   ;;  %v901_v32 = vadd.f32 %v1836_v52, %v900_v31 }
 0x19f   : > { %v950_v35 = vadd.f32 %v949_v21, %v901_v32 }
 0x1a1   : > { %v977_v38 = vmax.f32 %v950_v35, 0.0 }
 0x1a4   : > { %v902_v33 = vpop.f32.mrf.mxu2 }
 0x1a5   : > { %v903_v36 = vadd.f32 %v1836_v52, %v902_v33 }
 0x1a7   : > { %v952_v37 = vadd.f32 %v951_v29, %v903_v36 }
 0x1a9   : > { %v978_v39 = vmax.f32 %v952_v37, 0.0 }
 0x1ab   : > { %v1429_v40 = vpack.c.bf16 %v978_v39, %v977_v38 }
 0x1ac   : > { %v905_v41 = vpop.f32.mrf.mxu2 }
 0x1ad   : > { %1449 = vst [vmem:[%s1845_s26 + $0x20] sm:$0xff] %v1429_v40   ;;  %v906_v43 = vadd.f32 %v1836_v52, %v905_v41 }
 0x1af   : > { %v955_v45 = vadd.f32 %v954_v34, %v906_v43 }
 0x1b1   : > { %v979_v49 = vmax.f32 %v955_v45, 0.0 }
 0x1b4   : > { %v907_v44 = vpop.f32.mrf.mxu2 }
 0x1b5   : > { %v908_v46 = vadd.f32 %v1836_v52, %v907_v44 }
 0x1b7   : > { %v957_v47 = vadd.f32 %v956_v42, %v908_v46 }
 0x1b9   : > { %v980_v50 = vmax.f32 %v957_v47, 0.0 }
 0x1bb   : > { %v1434_v51 = vpack.c.bf16 %v980_v50, %v979_v49 }
 0x1bc   : > { %v910_v53 = vpop.f32.mrf.mxu2 }
 0x1bd   : > { %1450 = vst [vmem:[%s1845_s26 + $0x28] sm:$0xff] %v1434_v51   ;;  %v911_v54 = vadd.f32 %v1836_v52, %v910_v53 }
 0x1bf   : > { %v960_v57 = vadd.f32 %v959_v48, %v911_v54 }
 0x1c1   : > { %v981_v60 = vmax.f32 %v960_v57, 0.0 }
 0x1c4   : > { %v912_v56 = vpop.f32.mrf.mxu2 }
 0x1c5   : > { %v913_v58 = vadd.f32 %v1836_v52, %v912_v56 }
 0x1c7   : > { %v962_v59 = vadd.f32 %v961_v55, %v913_v58 }
 0x1c9   : > { %v982_v61 = vmax.f32 %v962_v59, 0.0 }
 0x1cb   : > { %v1439_v62 = vpack.c.bf16 %v982_v61, %v981_v60 }
 0x1cc   : > { %v915_v0 = vpop.f32.mrf.mxu2 }
 0x1cd   : > { %1451 = vst [vmem:[%s1845_s26 + $0x30] sm:$0xff] %v1439_v62   ;;  %v916_v1 = vadd.f32 %v1836_v52, %v915_v0 }
 0x1cf   : > { %v965_v3 = vadd.f32 %v964_v63, %v916_v1 }
 0x1d1   : > { %v983_v7 = vmax.f32 %v965_v3, 0.0 }
 0x1d4   : > { %v917_v2 = vpop.f32.mrf.mxu2 }
 0x1d5   : > { %v918_v4 = vadd.f32 %v1836_v52, %v917_v2 }
 0x1d7   : > { %v967_v6 = vadd.f32 %v966_v5, %v918_v4 }
 0x1d9   : > { %v984_v8 = vmax.f32 %v967_v6, 0.0 }
 0x1db   : > { %v1444_v9 = vpack.c.bf16 %v984_v8, %v983_v7 }
 0x1dd   : > { %1452 = vst [vmem:[%s1845_s26 + $0x38] sm:$0xff] %v1444_v9  }
 0x1de PF: > { %p16_p4 = scmp.ge.s32.totalorder %s1689_s6, 4   ;;  %s1892_s18 = smov %s1598_s19 }
 0x1df   : > { %s1893_s19 = smov %s1602_s20  ;;  %s1894_s20 = smov %s1699_s11 }
 0x1e0   : > { %s1895_s21 = smov %s1689_s6  ;;  %18 = sbr.rel (!%p16_p4) target bundleno = 4 (0x4), region = 87 }
 0x1e5   :  { %1039 = vsyncpa [#allocation3], 1 }
 0x1e6   :  { %1041 = vsyncpa [#allocation3 + $0x1], 1 }
 0x1e7   :  { %1042 = vsyncpa [#allocation5], 1 }

</bundles_post_ra>
